<compile_context>
chip_gen: v5e
topology: v5e:2x2
jax: 0.10.0
libtpu: 0.0.40
codegen_flags: <defaults>
</compile_context>

<pallas_src>
import numpy as np

import jax
import jax.numpy as jnp
from jax.experimental import pallas as pl
from jax.experimental.pallas import tpu as pltpu

C_HID = 32  # conv1 output channels (fixed by the module)
_HP = jax.lax.Precision.HIGHEST  # only used for the one-time table folding


def _upsampling_kernel(a1_ref, g1h_ref, g1l_ref, b1_ref, w2h_ref, w2l_ref,
                       b2_ref, o_ref):
    # a1_ref : VMEM (bn*Hcp, 3W)  f32   -- upsampled rows x 3 conv1 row taps
    # g1h/g1l: VMEM (3W, Wc*32)   bf16  -- conv1 taps + column replication (hi/lo)
    # b1_ref : VMEM (1, Wc*32)    f32   -- conv1 bias, channel-interleaved lanes
    # w2h/w2l: VMEM (Wc*32, 3Wu)  bf16  -- conv2 taps + both column pads (hi/lo)
    # b2_ref : SMEM (1,)          f32   -- conv2 bias scalar
    # o_ref  : VMEM (bn, Hu, Wu)  f32
    f32, bf16 = jnp.float32, jnp.bfloat16
    bn, Hu, Wu = o_ref.shape
    Hc = Hu - 2
    Hcp = a1_ref.shape[0] // bn

    # ---- stage 1: conv1 on the 2x-upsampled grid (3-pass bf16, one matmul
    #      chain for the whole batch tile: M = bn*Hcp) ----
    a1 = a1_ref[...]
    a1_hi = a1.astype(bf16)
    a1_lo = (a1 - a1_hi.astype(f32)).astype(bf16)
    g1_hi = g1h_ref[...]
    g1_lo = g1l_ref[...]
    acc1 = jnp.dot(a1_hi, g1_hi, preferred_element_type=f32)
    acc1 = acc1 + jnp.dot(a1_hi, g1_lo, preferred_element_type=f32)
    acc1 = acc1 + jnp.dot(a1_lo, g1_hi, preferred_element_type=f32)
    y1 = jnp.maximum(acc1 + b1_ref[...], 0.0)          # (bn*Hcp, Wc*32), single bias add

    # ---- stage 2: conv2 + both column pads folded into one banded table ----
    y1_hi = y1.astype(bf16)
    y1_lo = (y1 - y1_hi.astype(f32)).astype(bf16)
    w2_hi = w2h_ref[...]
    w2_lo = w2l_ref[...]
    t = jnp.dot(y1_hi, w2_hi, preferred_element_type=f32)
    t = t + jnp.dot(y1_hi, w2_lo, preferred_element_type=f32)
    t = t + jnp.dot(y1_lo, w2_hi, preferred_element_type=f32)   # (bn*Hcp, 3*Wu)

    bias2 = b2_ref[0]
    # ---- per-sample epilogue: the pre-conv2 row replication clamp and the
    #      final row pad are static row shifts / concats (no matmuls). ----
    for b in range(bn):
        r0 = b * Hcp
        t0 = t[r0:r0 + Hc, 0:Wu]            # conv2 row tap dh2 = 0
        t1 = t[r0:r0 + Hc, Wu:2 * Wu]       # dh2 = 1
        t2 = t[r0:r0 + Hc, 2 * Wu:3 * Wu]   # dh2 = 2
        c2 = (jnp.concatenate([t0[:1], t0[:-1]], axis=0)    # rows clip(p'-1)
              + t1
              + jnp.concatenate([t2[1:], t2[-1:]], axis=0)  # rows clip(p'+1)
              + bias2)                                       # (Hc, Wu)
        # final ReplicationPad2d rows -> (Hu, Wu), one full-tile store
        o_ref[b] = jnp.concatenate([c2[:1], c2, c2[-1:]], axis=0)


def _split_bf16(a):
    """Split an f32 array into bf16 (hi, lo) for an explicit 3-pass matmul."""
    hi = a.astype(jnp.bfloat16)
    lo = (a - hi.astype(jnp.float32)).astype(jnp.bfloat16)
    return hi, lo


def _build_tables(w1, b1, w2, H, W):
    """Fold upsample/pad structure and conv weights into dense matmul operands."""
    C = C_HID
    Hu, Wu = 2 * H, 2 * W
    Hc, Wc = Hu - 2, Wu - 2

    # static 0/1 selection patterns (numpy; shape-only, no weight values)
    j_idx = np.arange(Wc)[:, None]
    S1 = np.stack([((j_idx + dw) // 2) == np.arange(W)[None, :]
                   for dw in range(3)]).astype(np.float32)             # (3,Wc,W)
    qq = np.clip(np.arange(Wu) - 1, 0, Wc - 1)
    S2 = np.stack([np.clip(qq + dw - 1, 0, Wc - 1)[:, None] == np.arange(Wc)[None, :]
                   for dw in range(3)]).astype(np.float32)             # (3,Wu,Wc)

    # conv1: column replication + 3 column taps, channel-interleaved lanes,
    # row taps concatenated along K -> (3W, Wc*C)
    w1r = w1[:, 0, :, :].astype(jnp.float32)                           # (C, dh, dw)
    G1 = jnp.einsum('djb,chd->hbjc', S1, w1r, precision=_HP).reshape(3 * W, Wc * C)

    # conv2: channel contraction + pre-conv2 column clamp + final column pad,
    # row taps concatenated along N -> (Wc*C, 3*Wu)
    w2r = w2[0].astype(jnp.float32)                                    # (C, dh2, dw2)
    W2B = jnp.einsum('dqj,chd->jchq', S2, w2r, precision=_HP).reshape(Wc * C, 3 * Wu)

    b1row = jnp.tile(b1.astype(jnp.float32), Wc).reshape(1, Wc * C)

    g1_hi, g1_lo = _split_bf16(G1)
    w2_hi, w2_lo = _split_bf16(W2B)
    return g1_hi, g1_lo, b1row, w2_hi, w2_lo


def _pick_block_n(N, Hcp, K1, WcC, Wu3, Hu, Wu, *,
                  budget_bytes=32 * 1024 * 1024, max_bn=16):
    """VMEM-aware batch-tile size; keeps >= 2 grid steps so v7x's 2 TCs both work."""
    # resident tables (bf16 hi+lo pairs == one f32 table each), double-buffered
    tables = 2 * (4 * K1 * WcC + 4 * WcC * Wu3 + 4 * WcC)

    def step_bytes(bn):
        io = 2 * bn * 4 * (Hcp * K1 + Hu * Wu)               # in/out tiles, double-buffered
        live = bn * Hcp * (8 * K1 + 8 * WcC + 4 * Wu3)       # a1(+split), acc/y1(+split), t
        return tables + io + live

    cap = min(max(1, N // 2), max_bn)
    best = 1
    for bn in range(1, cap + 1):
        if N % bn == 0 and step_bytes(bn) <= budget_bytes:
            best = bn
    return best


def upsampling_layer(x, w1, b1, w2, b2, *, block_n=None):
    """x: (N,1,H,W) float32 NCHW.  Returns (N,1,2H,2W) float32 NCHW."""
    N, Cin, H, W = x.shape
    assert Cin == 1
    C = C_HID
    Hu, Wu = 2 * H, 2 * W
    Hc, Wc = Hu - 2, Wu - 2
    Hcp = ((Hc + 7) // 8) * 8          # per-sample rows padded to the sublane tile
    WcC = Wc * C
    K1 = 3 * W
    Wu3 = 3 * Wu

    g1_hi, g1_lo, b1row, w2_hi, w2_lo = _build_tables(w1, b1, w2, H, W)
    b2v = jnp.asarray(b2, jnp.float32).reshape(1)

    # Wrapper-side layout plumbing only: nearest-neighbour row upsample and the
    # three conv1 row taps, concatenated along K and flattened so the kernel
    # block is already 2D with 8-aligned per-sample row offsets.
    x2 = x[:, 0].astype(jnp.float32)                      # (N, H, W)
    xr = jnp.repeat(x2, 2, axis=1)                        # (N, 2H, W)
    a1 = jnp.concatenate([xr[:, 0:Hc], xr[:, 1:Hc + 1], xr[:, 2:Hc + 2]], axis=2)
    a1 = jnp.pad(a1, ((0, 0), (0, Hcp - Hc), (0, 0)))     # (N, Hcp, 3W)
    a1 = a1.reshape(N * Hcp, K1)

    if block_n is None:
        block_n = _pick_block_n(N, Hcp, K1, WcC, Wu3, Hu, Wu)
    assert N % block_n == 0

    grid = (N // block_n,)
    flops = 6 * N * Hcp * WcC * (K1 + Wu3)                # 3 bf16 passes per stage
    bytes_accessed = (4 * (N * Hcp * K1 + N * Hu * Wu + WcC)
                      + 2 * (g1_hi.size + g1_lo.size + w2_hi.size + w2_lo.size))

    out = pl.pallas_call(
        _upsampling_kernel,
        out_shape=jax.ShapeDtypeStruct((N, Hu, Wu), jnp.float32),
        grid=grid,
        in_specs=[
            pl.BlockSpec((block_n * Hcp, K1), lambda n: (n, 0)),   # A1 batch tile
            pl.BlockSpec((K1, WcC), lambda n: (0, 0)),             # G1 hi (resident)
            pl.BlockSpec((K1, WcC), lambda n: (0, 0)),             # G1 lo (resident)
            pl.BlockSpec((1, WcC), lambda n: (0, 0)),              # conv1 bias row
            pl.BlockSpec((WcC, Wu3), lambda n: (0, 0)),            # W2B hi (resident)
            pl.BlockSpec((WcC, Wu3), lambda n: (0, 0)),            # W2B lo (resident)
            pl.BlockSpec(memory_space=pltpu.MemorySpace.SMEM),     # conv2 bias scalar
        ],
        out_specs=pl.BlockSpec((block_n, Hu, Wu), lambda n: (n, 0, 0)),
        compiler_params=pltpu.CompilerParams(
            dimension_semantics=("parallel",),     # batch axis -> megacore-shardable
            vmem_limit_bytes=48 * 1024 * 1024,     # within v7x's 64 MiB physical
        ),
        cost_estimate=pl.CostEstimate(flops=flops, transcendentals=0,
                                      bytes_accessed=bytes_accessed),
    )(a1, g1_hi, g1_lo, b1row, w2_hi, w2_lo, b2v)
    return out[:, None, :, :]


def reference(x, w1, b1, w2, b2):
    """Pure-JAX reference matching the PyTorch forward."""
    xu = jnp.repeat(jnp.repeat(x, 2, axis=2), 2, axis=3)
    y = jax.lax.conv_general_dilated(
        xu, w1, (1, 1), 'VALID',
        dimension_numbers=('NCHW', 'OIHW', 'NCHW'), precision=_HP)
    y = jax.nn.relu(y + b1[None, :, None, None])
    y = jnp.pad(y, ((0, 0), (0, 0), (1, 1), (1, 1)), mode='edge')
    y = jax.lax.conv_general_dilated(
        y, w2, (1, 1), 'VALID',
        dimension_numbers=('NCHW', 'OIHW', 'NCHW'), precision=_HP)
    y = y + b2[None, :, None, None]
    y = jnp.pad(y, ((0, 0), (0, 0), (1, 1), (1, 1)), mode='edge')
    return y


if __name__ == "__main__":
    key = jax.random.PRNGKey(0)
    k1, k2, k3, k4, k5 = jax.random.split(key, 5)

    N, H, W = 2, 16, 16
    x = jax.random.normal(k1, (N, 1, H, W), dtype=jnp.float32)
    # deterministic synthetic parameters (shapes match nn.Conv2d in __init__)
    w1 = jax.random.normal(k2, (C_HID, 1, 3, 3), dtype=jnp.float32) * 0.1
    b1 = jax.random.normal(k3, (C_HID,), dtype=jnp.float32) * 0.1
    w2 = jax.random.normal(k4, (1, C_HID, 3, 3), dtype=jnp.float32) * 0.1
    b2 = jax.random.normal(k5, (1,), dtype=jnp.float32) * 0.1

    out = jax.block_until_ready(upsampling_layer(x, w1, b1, w2, b2))
    ref = jax.block_until_ready(reference(x, w1, b1, w2, b2))

    assert out.shape == (N, 1, 2 * H, 2 * W), out.shape
    if not jnp.allclose(out, ref, atol=2e-3, rtol=2e-3):
        err = float(jnp.max(jnp.abs(out - ref)))
        raise AssertionError(f"Pallas kernel does not match reference (max|err|={err:.3e})")
    print("KERNEL_OK")
</pallas_src>

<mosaic_0001>
module attributes {stable_mosaic.version = 11 : i64} {
  func.func @_upsampling_kernel(%arg0: i32, %arg1: memref<32x48xf32, #tpu.memory_space<vmem>>, %arg2: memref<48x960xbf16, #tpu.memory_space<vmem>>, %arg3: memref<48x960xbf16, #tpu.memory_space<vmem>>, %arg4: memref<1x960xf32, #tpu.memory_space<vmem>>, %arg5: memref<960x96xbf16, #tpu.memory_space<vmem>>, %arg6: memref<960x96xbf16, #tpu.memory_space<vmem>>, %arg7: memref<1xf32, #tpu.memory_space<smem>>, %arg8: memref<1x32x32xf32, #tpu.memory_space<vmem>>) attributes {dimension_semantics = [#tpu.dimension_semantics<parallel>], iteration_bounds = array<i64: 2>, scalar_prefetch = 0 : i64, scratch_operands = 0 : i64, tpu.core_type = #tpu.core_type<tc>, window_params = [{transform_indices = @transform_0, window_bounds = array<i64: 32, 48>}, {pipeline_mode = #tpu.pipeline_mode<synchronous>, transform_indices = @transform_1, window_bounds = array<i64: 48, 960>}, {pipeline_mode = #tpu.pipeline_mode<synchronous>, transform_indices = @transform_2, window_bounds = array<i64: 48, 960>}, {pipeline_mode = #tpu.pipeline_mode<synchronous>, transform_indices = @transform_3, window_bounds = array<i64: 1, 960>}, {pipeline_mode = #tpu.pipeline_mode<synchronous>, transform_indices = @transform_4, window_bounds = array<i64: 960, 96>}, {pipeline_mode = #tpu.pipeline_mode<synchronous>, transform_indices = @transform_5, window_bounds = array<i64: 960, 96>}, {transform_indices = @transform_6, window_bounds = array<i64: 1>}, {transform_indices = @transform_7, window_bounds = array<i64: 1, 32, 32>}]} {
    %c0 = arith.constant 0 : index
    %c0_0 = arith.constant 0 : index
    %0 = vector.load %arg1[%c0, %c0_0] : memref<32x48xf32, #tpu.memory_space<vmem>>, vector<32x48xf32>
    %1 = arith.truncf %0 : vector<32x48xf32> to vector<32x48xbf16>
    %2 = arith.extf %1 : vector<32x48xbf16> to vector<32x48xf32>
    %3 = arith.subf %0, %2 : vector<32x48xf32>
    %4 = arith.truncf %3 : vector<32x48xf32> to vector<32x48xbf16>
    %c0_1 = arith.constant 0 : index
    %c0_2 = arith.constant 0 : index
    %5 = vector.load %arg2[%c0_1, %c0_2] : memref<48x960xbf16, #tpu.memory_space<vmem>>, vector<48x960xbf16>
    %c0_3 = arith.constant 0 : index
    %c0_4 = arith.constant 0 : index
    %6 = vector.load %arg3[%c0_3, %c0_4] : memref<48x960xbf16, #tpu.memory_space<vmem>>, vector<48x960xbf16>
    %cst = arith.constant dense<0.000000e+00> : vector<32x960xf32>
    %7 = tpu.matmul %1, %5, %cst {dimension_numbers = #tpu.dot_dimension_numbers<[1], [0], [0], [1], [0, 0, 1, 1], [], []>} : vector<32x48xbf16>, vector<48x960xbf16>, vector<32x960xf32> -> vector<32x960xf32>
    %cst_5 = arith.constant dense<0.000000e+00> : vector<32x960xf32>
    %8 = tpu.matmul %1, %6, %cst_5 {dimension_numbers = #tpu.dot_dimension_numbers<[1], [0], [0], [1], [0, 0, 1, 1], [], []>} : vector<32x48xbf16>, vector<48x960xbf16>, vector<32x960xf32> -> vector<32x960xf32>
    %9 = arith.addf %7, %8 : vector<32x960xf32>
    %cst_6 = arith.constant dense<0.000000e+00> : vector<32x960xf32>
    %10 = tpu.matmul %4, %5, %cst_6 {dimension_numbers = #tpu.dot_dimension_numbers<[1], [0], [0], [1], [0, 0, 1, 1], [], []>} : vector<32x48xbf16>, vector<48x960xbf16>, vector<32x960xf32> -> vector<32x960xf32>
    %11 = arith.addf %9, %10 : vector<32x960xf32>
    %c0_7 = arith.constant 0 : index
    %c0_8 = arith.constant 0 : index
    %12 = vector.load %arg4[%c0_7, %c0_8] : memref<1x960xf32, #tpu.memory_space<vmem>>, vector<1x960xf32>
    %13 = vector.broadcast %12 : vector<1x960xf32> to vector<32x960xf32>
    %14 = arith.addf %11, %13 : vector<32x960xf32>
    %cst_9 = arith.constant 0.000000e+00 : f32
    %15 = vector.broadcast %cst_9 : f32 to vector<32x960xf32>
    %16 = arith.maximumf %14, %15 : vector<32x960xf32>
    %17 = arith.truncf %16 : vector<32x960xf32> to vector<32x960xbf16>
    %18 = arith.extf %17 : vector<32x960xbf16> to vector<32x960xf32>
    %19 = arith.subf %16, %18 : vector<32x960xf32>
    %20 = arith.truncf %19 : vector<32x960xf32> to vector<32x960xbf16>
    %c0_10 = arith.constant 0 : index
    %c0_11 = arith.constant 0 : index
    %21 = vector.load %arg5[%c0_10, %c0_11] : memref<960x96xbf16, #tpu.memory_space<vmem>>, vector<960x96xbf16>
    %c0_12 = arith.constant 0 : index
    %c0_13 = arith.constant 0 : index
    %22 = vector.load %arg6[%c0_12, %c0_13] : memref<960x96xbf16, #tpu.memory_space<vmem>>, vector<960x96xbf16>
    %cst_14 = arith.constant dense<0.000000e+00> : vector<32x96xf32>
    %23 = tpu.matmul %17, %21, %cst_14 {dimension_numbers = #tpu.dot_dimension_numbers<[1], [0], [0], [1], [0, 0, 1, 1], [], []>} : vector<32x960xbf16>, vector<960x96xbf16>, vector<32x96xf32> -> vector<32x96xf32>
    %cst_15 = arith.constant dense<0.000000e+00> : vector<32x96xf32>
    %24 = tpu.matmul %17, %22, %cst_15 {dimension_numbers = #tpu.dot_dimension_numbers<[1], [0], [0], [1], [0, 0, 1, 1], [], []>} : vector<32x960xbf16>, vector<960x96xbf16>, vector<32x96xf32> -> vector<32x96xf32>
    %25 = arith.addf %23, %24 : vector<32x96xf32>
    %cst_16 = arith.constant dense<0.000000e+00> : vector<32x96xf32>
    %26 = tpu.matmul %20, %21, %cst_16 {dimension_numbers = #tpu.dot_dimension_numbers<[1], [0], [0], [1], [0, 0, 1, 1], [], []>} : vector<32x960xbf16>, vector<960x96xbf16>, vector<32x96xf32> -> vector<32x96xf32>
    %27 = arith.addf %25, %26 : vector<32x96xf32>
    %c0_17 = arith.constant 0 : index
    %28 = memref.load %arg7[%c0_17] : memref<1xf32, #tpu.memory_space<smem>>
    %29 = vector.extract_strided_slice %27 {offsets = [0, 0], sizes = [30, 32], strides = [1, 1]} : vector<32x96xf32> to vector<30x32xf32>
    %30 = vector.extract_strided_slice %27 {offsets = [0, 32], sizes = [30, 32], strides = [1, 1]} : vector<32x96xf32> to vector<30x32xf32>
    %31 = vector.extract_strided_slice %27 {offsets = [0, 64], sizes = [30, 32], strides = [1, 1]} : vector<32x96xf32> to vector<30x32xf32>
    %32 = vector.extract_strided_slice %29 {offsets = [0, 0], sizes = [1, 32], strides = [1, 1]} : vector<30x32xf32> to vector<1x32xf32>
    %33 = vector.extract_strided_slice %29 {offsets = [0, 0], sizes = [29, 32], strides = [1, 1]} : vector<30x32xf32> to vector<29x32xf32>
    %34 = tpu.concatenate %32, %33 in 0 : vector<1x32xf32>, vector<29x32xf32> -> vector<30x32xf32>
    %35 = arith.addf %34, %30 : vector<30x32xf32>
    %36 = vector.extract_strided_slice %31 {offsets = [1, 0], sizes = [29, 32], strides = [1, 1]} : vector<30x32xf32> to vector<29x32xf32>
    %37 = vector.extract_strided_slice %31 {offsets = [29, 0], sizes = [1, 32], strides = [1, 1]} : vector<30x32xf32> to vector<1x32xf32>
    %38 = tpu.concatenate %36, %37 in 0 : vector<29x32xf32>, vector<1x32xf32> -> vector<30x32xf32>
    %39 = arith.addf %35, %38 : vector<30x32xf32>
    %40 = vector.broadcast %28 : f32 to vector<30x32xf32>
    %41 = arith.addf %39, %40 : vector<30x32xf32>
    %42 = vector.extract_strided_slice %41 {offsets = [0, 0], sizes = [1, 32], strides = [1, 1]} : vector<30x32xf32> to vector<1x32xf32>
    %43 = vector.extract_strided_slice %41 {offsets = [29, 0], sizes = [1, 32], strides = [1, 1]} : vector<30x32xf32> to vector<1x32xf32>
    %44 = tpu.concatenate %42, %41, %43 in 0 : vector<1x32xf32>, vector<30x32xf32>, vector<1x32xf32> -> vector<32x32xf32>
    %c0_18 = arith.constant 0 : index
    %c0_19 = arith.constant 0 : index
    %c0_20 = arith.constant 0 : index
    %45 = vector.load %arg8[%c0_18, %c0_19, %c0_20] : memref<1x32x32xf32, #tpu.memory_space<vmem>>, vector<1x32x32xf32>
    %46 = vector.shape_cast %45 : vector<1x32x32xf32> to vector<32x32xf32>
    %47 = vector.shape_cast %44 : vector<32x32xf32> to vector<1x32x32xf32>
    tpu.vector_store %arg8[%c0_18, %c0_19, %c0_20], %47 {strides = array<i32>} : memref<1x32x32xf32, #tpu.memory_space<vmem>>, vector<1x32x32xf32>,
    return
  }
  func.func @transform_0(%arg0: i32) -> (i32, i32) {
    %c0_i32 = arith.constant 0 : i32
    %c0_i32_0 = arith.constant 0 : i32
    return %arg0, %c0_i32 : i32, i32
  }
  func.func @transform_1(%arg0: i32) -> (i32, i32) {
    %c0_i32 = arith.constant 0 : i32
    %c0_i32_0 = arith.constant 0 : i32
    %c0_i32_1 = arith.constant 0 : i32
    return %c0_i32, %c0_i32_0 : i32, i32
  }
  func.func @transform_2(%arg0: i32) -> (i32, i32) {
    %c0_i32 = arith.constant 0 : i32
    %c0_i32_0 = arith.constant 0 : i32
    %c0_i32_1 = arith.constant 0 : i32
    return %c0_i32, %c0_i32_0 : i32, i32
  }
  func.func @transform_3(%arg0: i32) -> (i32, i32) {
    %c0_i32 = arith.constant 0 : i32
    %c0_i32_0 = arith.constant 0 : i32
    %c0_i32_1 = arith.constant 0 : i32
    return %c0_i32, %c0_i32_0 : i32, i32
  }
  func.func @transform_4(%arg0: i32) -> (i32, i32) {
    %c0_i32 = arith.constant 0 : i32
    %c0_i32_0 = arith.constant 0 : i32
    %c0_i32_1 = arith.constant 0 : i32
    return %c0_i32, %c0_i32_0 : i32, i32
  }
  func.func @transform_5(%arg0: i32) -> (i32, i32) {
    %c0_i32 = arith.constant 0 : i32
    %c0_i32_0 = arith.constant 0 : i32
    %c0_i32_1 = arith.constant 0 : i32
    return %c0_i32, %c0_i32_0 : i32, i32
  }
  func.func @transform_6(%arg0: i32) -> i32 {
    %c0_i32 = arith.constant 0 : i32
    %c0_i32_0 = arith.constant 0 : i32
    return %c0_i32 : i32
  }
  func.func @transform_7(%arg0: i32) -> (i32, i32, i32) {
    %c0_i32 = arith.constant 0 : i32
    %c0_i32_0 = arith.constant 0 : i32
    %c0_i32_1 = arith.constant 0 : i32
    return %arg0, %c0_i32, %c0_i32_0 : i32, i32, i32
  }
}

</mosaic_0001>

<bundles_post_ra>
// kernel: tpu_custom_call.1
= control target key start
LH: loop header
LB: loop body
LE: loop exit
PB: predicated region body
PF: predicated region fallthrough
CT: control target
= control target key end

     0   :  { %s5835_s0 = inlined_call_operand.vmem [shape: f32[64,48], index: 0, kind: input, shape index: {}]   ;;  %s5836_s1 = inlined_call_operand.vmem [shape: bf16[48,960], index: 1, kind: input, shape index: {}]   ;;  %s5837_s2 = inlined_call_operand.vmem [shape: bf16[48,960], index: 2, kind: input, shape index: {}]   ;;  %s5838_s3 = inlined_call_operand.vmem [shape: f32[1,960], index: 3, kind: input, shape index: {}]   ;;  %s5839_s4 = inlined_call_operand.vmem [shape: bf16[960,96], index: 4, kind: input, shape index: {}]   ;;  %s5840_s5 = inlined_call_operand.vmem [shape: bf16[960,96], index: 5, kind: input, shape index: {}]   ;;  %s5841_s6 = inlined_call_operand.<no memory space> [shape: f32[1], index: 6, kind: input, shape index: {}]   ;;  %s5842_s7 = inlined_call_operand.hbm [shape: f32[2,32,32], index: 7, kind: output, shape index: {}]  }
   0x1   :  { %12 = sst [smem:[#allocation2]] %s5841_s6 }
   0x2   :  { %13 = vsyncpa [#allocation4], 0 }
   0x3   :  { %15 = vsyncpa [#allocation4 + $0x1], 0  ;;  %s4017_s26 = smov 0   ;;  %s4019_s27 = smov 0  }
   0x4   :  { %s4021_s28 = smov 0   ;;  %s4023_s29 = smov 0  }
   0x5 LB: > { %s4038_s6 = sadd.s32 4294967295, %s3968_s29   ;;  %s2956_s30 = sadd.s32 4294967294, %s3968_s29   ;;  %s3968_s29 = sphi %s4023_s29, %s6025_s29   ;;  %s3964_s28 = sphi %s4021_s28, %s6024_s28   ;;  %s3960_s27 = sphi %s4019_s27, %s6023_s27   ;;  %s3956_s26 = sphi %s4017_s26, %s6022_s26  }
   0x6   : > { %s4042_s8 = sadd.s32 1, %s3968_s29   ;;  %s180_s9 = sadd.s32 1, %s3964_s28 }
   0x7   : > { %s177_s10 = ssub.s32 %s3968_s29, %s4042_s8  ;;  %p190_p0 = scmp.ne.s32.totalorder %s3964_s28, %s3960_s27 }
   0x8   : > { %p178_p1 = scmp.eq.s32.totalorder %s177_s10, 0  ;;  %p191_p2 = scmp.eq.s32.totalorder %s4038_s6, 1 }
   0x9   : > { %p196_p3 = scmp.ne.s32.totalorder %s3960_s27, %s3956_s26  ;;  %p197_p4 = scmp.eq.s32.totalorder %s2956_s30, 1 }
   0xa   : > { %s4053_s11 = scalar_select %p178_p1, %s3964_s28, %s180_s9  }
   0xb   : > { %p4055_p5 = por %p191_p2, %p190_p0  ;;  %p4059_p6 = por %p197_p4, %p196_p3 }
   0xc   : > { %p2959_p7 = scmp.ge.s32.totalorder %s3968_s29, 1  ;;  %p242_p8 = scmp.lt.s32.totalorder %s3968_s29, 3 }
   0xe   : > { %p243_p9 = pnand %p2959_p7, %p242_p8 }
  0x10   : > { %246 = sbr.rel (%p243_p9) target bundleno = 788 (0x314), region = 48 }
  0x15   : > { %v3029_v0 = vld [vmem:[%s5837_s2 + $0x80] sm:$0xf]  ;;  %v3734_v2 = vld [vmem:[%s5837_s2 + $0x84] sm:$0xf]  ;;  %v3037_v5 = vld [vmem:[%s5837_s2 + $0x88] sm:$0xf] }
  0x16   : > { %v3738_v1 = vld [vmem:[%s5837_s2 + $0x9c] sm:$0xf0]  ;;  %v3031_v4 = vld [vmem:[%s5837_s2 + $0xa0] sm:$0xf0]  ;;  %v3739_v6 = vld [vmem:[%s5837_s2 + $0xa4] sm:$0xf0] }
  0x17   : > { %v3030_v3 = vor.u32 %v3738_v1, %v3029_v0  ;;  %v3034_v7 = vor.u32 %v3734_v2, %v3031_v4  ;;  %v3038_v8 = vor.u32 %v3739_v6, %v3037_v5  ;;  %v3735_v9 = vld [vmem:[%s5837_s2 + $0x8c] sm:$0xf]  ;;  %v2997_v11 = vld [vmem:[%s5837_s2 + $0x40] sm:$0xf]  ;;  %v3726_v14 = vld [vmem:[%s5837_s2 + $0x44] sm:$0xf] }
  0x18   : > { %v3039_v10 = vld [vmem:[%s5837_s2 + $0xa8] sm:$0xf0]  ;;  %v3730_v13 = vld [vmem:[%s5837_s2 + $0x5c] sm:$0xf0]  ;;  %v2999_v15 = vld [vmem:[%s5837_s2 + $0x60] sm:$0xf0] }
  0x19   : > { %489 = vmatpush.bf16.msra.mxu0 %v3030_v3  ;;  %v3042_v12 = vor.u32 %v3735_v9, %v3039_v10  ;;  %508 = vmatpush.bf16.msra.mxu1 %v3034_v7  ;;  %v2998_v16 = vor.u32 %v3730_v13, %v2997_v11  ;;  %v3002_v17 = vor.u32 %v3726_v14, %v2999_v15  ;;  %v3005_v18 = vld [vmem:[%s5837_s2 + $0x48] sm:$0xf]  ;;  %v3727_v20 = vld [vmem:[%s5837_s2 + $0x4c] sm:$0xf]  ;;  %v2965_v23 = vld [vmem:[%s5837_s2] sm:$0xf] }
  0x1a   : > { %527 = vmatpush.bf16.msra.mxu2 %v3038_v8  ;;  %v3731_v19 = vld [vmem:[%s5837_s2 + $0x64] sm:$0xf0]  ;;  %v3007_v22 = vld [vmem:[%s5837_s2 + $0x68] sm:$0xf0]  ;;  %v3722_v24 = vld [vmem:[%s5837_s2 + $0x1c] sm:$0xf0] }
  0x1b   : > { %546 = vmatpush.bf16.msra.mxu3 %v3042_v12  ;;  %v3006_v21 = vor.u32 %v3731_v19, %v3005_v18  ;;  %v3010_v25 = vor.u32 %v3727_v20, %v3007_v22  ;;  %v3718_v26 = vld [vmem:[%s5837_s2 + $0x4] sm:$0xf]  ;;  %v2973_v28 = vld [vmem:[%s5837_s2 + $0x8] sm:$0xf]  ;;  %v2966_v29 = vor.u32 %v3722_v24, %v2965_v23  ;;  %v3719_v31 = vld [vmem:[%s5837_s2 + $0xc] sm:$0xf] }
  0x1c   : > { %v2967_v27 = vld [vmem:[%s5837_s2 + $0x20] sm:$0xf0]  ;;  %v3723_v30 = vld [vmem:[%s5837_s2 + $0x24] sm:$0xf0]  ;;  %v2975_v32 = vld [vmem:[%s5837_s2 + $0x28] sm:$0xf0] }
  0x1d   : > { %490 = vmatpush.bf16.msra.mxu0 %v2998_v16  ;;  %509 = vmatpush.bf16.msra.mxu1 %v3002_v17  ;;  %v2970_v33 = vor.u32 %v3718_v26, %v2967_v27  ;;  %v2974_v34 = vor.u32 %v3723_v30, %v2973_v28  ;;  %s2961_s17 = sshll.u32 %s4038_s6, 2  ;;  %v3053_v35 = vld [vmem:[%s5837_s2 + $0x98] sm:$0xf]  ;;  %v2978_v37 = vor.u32 %v3719_v31, %v2975_v32  ;;  %v3737_v39 = vld [vmem:[%s5837_s2 + $0x9c] sm:$0xf]  ;;  %vm477_vm0 = vcmask 392192  }
  0x1e   : > { %528 = vmatpush.bf16.msra.mxu2 %v3006_v21  ;;  %v3741_v36 = vld [vmem:[%s5837_s2 + $0xb4] sm:$0xf0]  ;;  %p275_p10 = scmp.lt.s32.totalorder %s2961_s17, 7  ;;  %v3055_v40 = vld [vmem:[%s5837_s2 + $0xb8] sm:$0xf0]  ;;  %vm1954_vm1 = vcmask 523264  }
  0x1f   : > { %547 = vmatpush.bf16.msra.mxu3 %v3010_v25  ;;  %v3054_v38 = vor.u32 %v3741_v36, %v3053_v35  ;;  %v3058_v41 = vor.u32 %v3737_v39, %v3055_v40  ;;  %v3045_v42 = vld [vmem:[%s5837_s2 + $0x90] sm:$0xf]  ;;  %v3736_v44 = vld [vmem:[%s5837_s2 + $0x94] sm:$0xf]  ;;  %v3021_v47 = vld [vmem:[%s5837_s2 + $0x58] sm:$0xf] }
  0x20   : > { %v3740_v43 = vld [vmem:[%s5837_s2 + $0xac] sm:$0xf0]  ;;  %s6027_s17 = smov (!%p275_p10, %s2961_s17), 7  ;;  %v3047_v46 = vld [vmem:[%s5837_s2 + $0xb0] sm:$0xf0]  ;;  %s3970_s20 = smov 96  }
  0x21   : > { %491 = vmatpush.bf16.msra.mxu0 %v2966_v29  ;;  %v3046_v45 = vor.u32 %v3740_v43, %v3045_v42  ;;  %510 = vmatpush.bf16.msra.mxu1 %v2970_v33  ;;  %v3050_v48 = vor.u32 %v3736_v44, %v3047_v46  ;;  %v3733_v49 = vld [vmem:[%s5837_s2 + $0x74] sm:$0xf0]  ;;  %v3729_v50 = vld [vmem:[%s5837_s2 + $0x5c] sm:$0xf]  ;;  %s2962_s10 = sshll.u32 %s6027_s17, 3  ;;  %vm2821_vm2 = vcmask 1046528  }
  0x22   : > { %529 = vmatpush.bf16.msra.mxu2 %v2974_v34  ;;  %v3023_v51 = vld [vmem:[%s5837_s2 + $0x78] sm:$0xf0]  ;;  %v3022_v52 = vor.u32 %v3733_v49, %v3021_v47  ;;  %v3013_v53 = vld [vmem:[%s5837_s2 + $0x50] sm:$0xf]  ;;  %s4183_s21 = scalar_lea.vmem %s5835_s0, %s2962_s10  ;;  %v3728_v57 = vld [vmem:[%s5837_s2 + $0x54] sm:$0xf] }
  0x23   : > { %548 = vmatpush.bf16.msra.mxu3 %v2978_v37  ;;  %v3732_v54 = vld [vmem:[%s5837_s2 + $0x6c] sm:$0xf0]  ;;  %v3026_v55 = vor.u32 %v3729_v50, %v3023_v51  ;;  %v3015_v58 = vld [vmem:[%s5837_s2 + $0x70] sm:$0xf0]  ;;  %v2989_v59 = vld [vmem:[%s5837_s2 + $0x18] sm:$0xf] }
  0x24   : > { %v3014_v56 = vor.u32 %v3732_v54, %v3013_v53  ;;  %v4195_v60 = vld [vmem:[%s4183_s21] sm:$0xff]  ;;  %v4198_v61 = vld [vmem:[%s4183_s21 + $0x8] sm:$0xff]  ;;  %v3018_v62 = vor.u32 %v3728_v57, %v3015_v58  ;;  %v3725_v1 = vld [vmem:[%s5837_s2 + $0x34] sm:$0xf0]  ;;  %vm2792_vm3 = vcmask 1040384   ;;  %s3971_s17 = smov 64  }
  0x25   : > { %565 = vmatpush.bf16.msrb.mxu0 %v3046_v45  ;;  %584 = vmatpush.bf16.msrb.mxu1 %v3050_v48  ;;  %v4202_v63 = vpack.c.bf16 %v4195_v60, %v4195_v60  ;;  %v4206_v0 = vpack.c.bf16 %v4198_v61, %v4198_v61  ;;  %v3721_v2 = vld [vmem:[%s5837_s2 + $0x1c] sm:$0xf]  ;;  %v2990_v3 = vor.u32 %v3725_v1, %v2989_v59  ;;  %v2981_v5 = vld [vmem:[%s5837_s2 + $0x10] sm:$0xf]  ;;  %v3720_v9 = vld [vmem:[%s5837_s2 + $0x14] sm:$0xf] }
  0x26   : > { %603 = vmatpush.bf16.msrb.mxu2 %v3054_v38  ;;  %v2991_v4 = vld [vmem:[%s5837_s2 + $0x38] sm:$0xf0]  ;;  %v3724_v6 = vld [vmem:[%s5837_s2 + $0x2c] sm:$0xf0]  ;;  %v2983_v10 = vld [vmem:[%s5837_s2 + $0x30] sm:$0xf0] }
  0x27   : > { %622 = vmatpush.bf16.msrb.mxu3 %v3058_v41  ;;  %v351_v7 = vunpack.c.l.b16 %v4202_v63  ;;  %v352_v8 = vunpack.c.l.b16 %v4206_v0  ;;  %v2994_v12 = vor.u32 %v3721_v2, %v2991_v4  ;;  %v2982_v13 = vor.u32 %v3724_v6, %v2981_v5  ;;  %v4238_v15 = vld [vmem:[%s4183_s21 + $0x10] sm:$0xff]  ;;  %v4241_v16 = vld [vmem:[%s4183_s21 + $0x18] sm:$0xff]  ;;  %v3149_v17 = vld [vmem:[%s5836_s1 + $0x88] sm:$0xf]  ;;  %s2787_s22 = sld [smem:[#allocation2]]  ;;  %s271_s23 = sand.u32 1, %s3960_s27  }
  0x28   : > { %v2986_v14 = vor.u32 %v3720_v9, %v2983_v10  ;;  %v3715_v18 = vld [vmem:[%s5836_s1 + $0xa4] sm:$0xf0]  ;;  %v3711_v19 = vld [vmem:[%s5836_s1 + $0x8c] sm:$0xf]  ;;  %v3141_v22 = vld [vmem:[%s5836_s1 + $0x80] sm:$0xf]  ;;  %v4282_v29 = vpack.c.bf16 %v4238_v15, %v4238_v15  ;;  %v4286_v30 = vpack.c.bf16 %v4241_v16, %v4241_v16 }
  0x29   : > { %566 = vmatpush.bf16.msrb.mxu0 %v3014_v56  ;;  %585 = vmatpush.bf16.msrb.mxu1 %v3018_v62  ;;  %v4231_v11 = vpack.c.b16 %v352_v8, %v351_v7  ;;  %v4256_v20 = vor.u32 %v3715_v18, %v3149_v17  ;;  %v3151_v21 = vld [vmem:[%s5836_s1 + $0xa8] sm:$0xf0]  ;;  %v3714_v23 = vld [vmem:[%s5836_s1 + $0x9c] sm:$0xf0]  ;;  %v3710_v26 = vld [vmem:[%s5836_s1 + $0x84] sm:$0xf] }
  0x2a   : > { %604 = vmatpush.bf16.msrb.mxu2 %v3022_v52  ;;  %v4267_v24 = vor.u32 %v3711_v19, %v3151_v21  ;;  %v4269_v25 = vor.u32 %v3714_v23, %v3141_v22  ;;  %v3143_v27 = vld [vmem:[%s5836_s1 + $0xa0] sm:$0xf0]  ;;  %v3117_v28 = vld [vmem:[%s5836_s1 + $0x48] sm:$0xf]  ;;  %v3703_v33 = vld [vmem:[%s5836_s1 + $0x4c] sm:$0xf]  ;;  %v353_v37 = vunpack.c.l.b16 %v4282_v29  ;;  %v354_v38 = vunpack.c.l.b16 %v4286_v30 }
  0x2b   : > { %623 = vmatpush.bf16.msrb.mxu3 %v3026_v55  ;;  %3059 = vmatmul.msk.bf16.vlgmr.msra.gmra.mxu0 %vm477_vm0, %v4231_v11  ;;  %v4289_v31 = vor.u32 %v3710_v26, %v3143_v27  ;;  %v3707_v32 = vld [vmem:[%s5836_s1 + $0x64] sm:$0xf0]  ;;  %v3119_v34 = vld [vmem:[%s5836_s1 + $0x68] sm:$0xf0]  ;;  %v3109_v40 = vld [vmem:[%s5836_s1 + $0x40] sm:$0xf] }
  0x2c   : > { %3061 = vmatmul.msk.bf16.vlgmr.msra.gmra.mxu1 %vm477_vm0, %v4231_v11  ;;  %3063 = vmatmul.msk.bf16.vlgmr.msra.gmra.mxu2 %vm477_vm0, %v4231_v11  ;;  %v4302_v35 = vor.u32 %v3707_v32, %v3117_v28  ;;  %v4304_v36 = vor.u32 %v3703_v33, %v3119_v34  ;;  %v4311_v39 = vpack.c.b16 %v354_v38, %v353_v37  ;;  %v3706_v41 = vld [vmem:[%s5836_s1 + $0x5c] sm:$0xf0]  ;;  %v3702_v42 = vld [vmem:[%s5836_s1 + $0x44] sm:$0xf]  ;;  %v3085_v45 = vld [vmem:[%s5836_s1 + $0x8] sm:$0xf] }
  0x2d   : > { %3065 = vmatmul.msk.bf16.vlgmr.msra.gmra.mxu3 %vm477_vm0, %v4231_v11  ;;  %567 = vmatpush.bf16.msrb.mxu0 %v2982_v13  ;;  %v4330_v43 = vor.u32 %v3706_v41, %v3109_v40  ;;  %v3111_v44 = vld [vmem:[%s5836_s1 + $0x60] sm:$0xf0]  ;;  %v3699_v46 = vld [vmem:[%s5836_s1 + $0x24] sm:$0xf0]  ;;  %v3695_v49 = vld [vmem:[%s5836_s1 + $0xc] sm:$0xf] }
  0x2e   : > { %605 = vmatpush.bf16.msrb.mxu2 %v2990_v3  ;;  %586 = vmatpush.bf16.msrb.mxu1 %v2986_v14  ;;  %v4341_v47 = vor.u32 %v3702_v42, %v3111_v44  ;;  %v4343_v48 = vor.u32 %v3699_v46, %v3085_v45  ;;  %v3087_v50 = vld [vmem:[%s5836_s1 + $0x28] sm:$0xf0]  ;;  %v3077_v51 = vld [vmem:[%s5836_s1] sm:$0xf]  ;;  %v3694_v54 = vld [vmem:[%s5836_s1 + $0x4] sm:$0xf] }
  0x2f   : > { %624 = vmatpush.bf16.msrb.mxu3 %v2994_v12  ;;  %v4355_v52 = vor.u32 %v3695_v49, %v3087_v50  ;;  %v3698_v53 = vld [vmem:[%s5836_s1 + $0x1c] sm:$0xf0]  ;;  %v3079_v55 = vld [vmem:[%s5836_s1 + $0x20] sm:$0xf0]  ;;  %v3165_v58 = vld [vmem:[%s5836_s1 + $0x98] sm:$0xf] }
  0x30   : > { %v4368_v56 = vor.u32 %v3698_v53, %v3077_v51  ;;  %v4370_v57 = vor.u32 %v3694_v54, %v3079_v55  ;;  %v3717_v59 = vld [vmem:[%s5836_s1 + $0xb4] sm:$0xf0]  ;;  %v3713_v62 = vld [vmem:[%s5836_s1 + $0x9c] sm:$0xf]  ;;  %v3157_v3 = vld [vmem:[%s5836_s1 + $0x90] sm:$0xf] }
  0x31   : > { %761 = vmatpush.bf16.msra.mxu0 %v4269_v25  ;;  %v4392_v1 = vor.u32 %v3717_v59, %v3165_v58  ;;  %v3167_v2 = vld [vmem:[%s5836_s1 + $0xb8] sm:$0xf0]  ;;  %v3716_v4 = vld [vmem:[%s5836_s1 + $0xac] sm:$0xf0]  ;;  %v3712_v7 = vld [vmem:[%s5836_s1 + $0x94] sm:$0xf] }
  0x32   : > { %799 = vmatpush.bf16.msra.mxu2 %v4256_v20  ;;  %780 = vmatpush.bf16.msra.mxu1 %v4289_v31  ;;  %v4403_v5 = vor.u32 %v3713_v62, %v3167_v2  ;;  %v4405_v6 = vor.u32 %v3716_v4, %v3157_v3  ;;  %v3159_v8 = vld [vmem:[%s5836_s1 + $0xb0] sm:$0xf0]  ;;  %v3133_v9 = vld [vmem:[%s5836_s1 + $0x58] sm:$0xf]  ;;  %v3705_v13 = vld [vmem:[%s5836_s1 + $0x5c] sm:$0xf] }
  0x33   : > { %818 = vmatpush.bf16.msra.mxu3 %v4267_v24  ;;  %v4417_v10 = vor.u32 %v3712_v7, %v3159_v8  ;;  %v3709_v12 = vld [vmem:[%s5836_s1 + $0x74] sm:$0xf0]  ;;  %v3135_v14 = vld [vmem:[%s5836_s1 + $0x78] sm:$0xf0]  ;;  %v3125_v19 = vld [vmem:[%s5836_s1 + $0x50] sm:$0xf] }
  0x34   : > { %v3134_v17 = vor.u32 %v3709_v12, %v3133_v9  ;;  %v3138_v18 = vor.u32 %v3705_v13, %v3135_v14  ;;  %v3708_v21 = vld [vmem:[%s5836_s1 + $0x6c] sm:$0xf0]  ;;  %v3704_v22 = vld [vmem:[%s5836_s1 + $0x54] sm:$0xf]  ;;  %v3101_v27 = vld [vmem:[%s5836_s1 + $0x18] sm:$0xf] }
  0x35   : > { %762 = vmatpush.bf16.msra.mxu0 %v4330_v43  ;;  %v3126_v23 = vor.u32 %v3708_v21, %v3125_v19  ;;  %v3127_v26 = vld [vmem:[%s5836_s1 + $0x70] sm:$0xf0]  ;;  %v3701_v28 = vld [vmem:[%s5836_s1 + $0x34] sm:$0xf0]  ;;  %v3697_v34 = vld [vmem:[%s5836_s1 + $0x1c] sm:$0xf] }
  0x36   : > { %800 = vmatpush.bf16.msra.mxu2 %v4302_v35  ;;  %781 = vmatpush.bf16.msra.mxu1 %v4341_v47  ;;  %v3130_v32 = vor.u32 %v3704_v22, %v3127_v26  ;;  %v3102_v33 = vor.u32 %v3701_v28, %v3101_v27  ;;  %v3103_v37 = vld [vmem:[%s5836_s1 + $0x38] sm:$0xf0]  ;;  %v3093_v38 = vld [vmem:[%s5836_s1 + $0x10] sm:$0xf]  ;;  %v3696_v42 = vld [vmem:[%s5836_s1 + $0x14] sm:$0xf] }
  0x37   : > { %819 = vmatpush.bf16.msra.mxu3 %v4304_v36  ;;  %v3106_v40 = vor.u32 %v3697_v34, %v3103_v37  ;;  %v3700_v41 = vld [vmem:[%s5836_s1 + $0x2c] sm:$0xf0]  ;;  %v3095_v44 = vld [vmem:[%s5836_s1 + $0x30] sm:$0xf0]  ;;  %vm2830_vm4 = vcmask 1044480   ;;  %s2960_s24 = sshll.u32 %s271_s23, 5 }
  0x38   : > { %v3094_v45 = vor.u32 %v3700_v41, %v3093_v38  ;;  %v3098_v46 = vor.u32 %v3696_v42, %v3095_v44  ;;  %v3817_v41 = vld [vmem:[%s5840_s5 + $0x78] sm:$0xff]  ;;  %vm2873_vm5 = vcmask 261120   ;;  %s273_s25 = scalar_lea.vmem [#allocation3], %s2960_s24  ;;  %s3862_s30 = sshll.u32 %s4038_s6, 5 }
  0x39   : > { %763 = vmatpush.bf16.msra.mxu0 %v4368_v56  ;;  %s2890_s14 = scalar_lea.hbm %s5842_s7, %s3862_s30  ;;  %s2891_s15 = sshll.u32 %s273_s25, 4  ;;  %s2892_s15 = int_to_ptr.vmem [resolvable:$true] %s2891_s15 }
  0x3a   : > { %801 = vmatpush.bf16.msra.mxu2 %v4343_v48  ;;  %782 = vmatpush.bf16.msra.mxu1 %v4370_v57  ;;  %s2893_s6 = sshll.u32 %s2890_s14, 4  ;;  %s2879_s16 = scalar_lea.sflag [#allocation4], %s271_s23  ;;  %s2894_s6 = int_to_ptr.hbm [resolvable:$true] %s2893_s6 }
  0x3b   : > { %3060 = vmatmul.msk.bf16.gmra.mxu0 %vm477_vm0, %v4311_v39  ;;  %820 = vmatpush.bf16.msra.mxu3 %v4355_v52  ;;  %s3920_s18 = sshra.s32 %s2894_s6, 4  ;;  %s3921_s18 = int_to_ptr.hbm [resolvable:$true] %s3920_s18 }
  0x3c   : > { %3062 = vmatmul.msk.bf16.gmra.mxu1 %vm477_vm0, %v4311_v39  ;;  %3064 = vmatmul.msk.bf16.gmra.mxu2 %vm477_vm0, %v4311_v39  ;;  %s3922_s21 = scalar_lea.hbm %s3921_s18, 32  ;;  %p3927_p0 = scmp.lt.s32.totalorder %s3921_s18, %s5842_s7 }
  0x3d   : > { %3066 = vmatmul.msk.bf16.gmra.mxu3 %vm477_vm0, %v4311_v39  ;;  %p3923_p11 = scmp.ne.s32.totalorder %s3921_s18, %s3922_s21 }
  0x3f   : > { %p3924_p12 = pnand %p3923_p11, %p4055_p5 }
  0x41   : > { %p3925_p13 = pneg %p3924_p12 }
  0x4b   : > { %3067 = vmatmul.msk.bf16.vlgmr.msrb.gmra.mxu0 %vm477_vm0, %v4231_v11 }
  0x4c   : > { %3069 = vmatmul.msk.bf16.vlgmr.msrb.gmra.mxu1 %vm477_vm0, %v4231_v11  ;;  %3071 = vmatmul.msk.bf16.vlgmr.msrb.gmra.mxu2 %vm477_vm0, %v4231_v11 }
  0x4d   : > { %3073 = vmatmul.msk.bf16.vlgmr.msrb.gmra.mxu3 %vm477_vm0, %v4231_v11  ;;  %875 = vmatpush.bf16.msrb.mxu2 %v4392_v1 }
  0x4e   : > { %894 = vmatpush.bf16.msrb.mxu3 %v4403_v5  ;;  %837 = vmatpush.bf16.msrb.mxu0 %v4405_v6 }
  0x4f   : > { %856 = vmatpush.bf16.msrb.mxu1 %v4417_v10 }
  0x51   : > { %876 = vmatpush.bf16.msrb.mxu2 %v3134_v17 }
  0x52   : > { %895 = vmatpush.bf16.msrb.mxu3 %v3138_v18  ;;  %838 = vmatpush.bf16.msrb.mxu0 %v3126_v23 }
  0x53   : > { %857 = vmatpush.bf16.msrb.mxu1 %v3130_v32 }
  0x55   : > { %877 = vmatpush.bf16.msrb.mxu2 %v3102_v33 }
  0x56   : > { %896 = vmatpush.bf16.msrb.mxu3 %v3106_v40  ;;  %839 = vmatpush.bf16.msrb.mxu0 %v3094_v45 }
  0x57   : > { %858 = vmatpush.bf16.msrb.mxu1 %v3098_v46 }
  0x5b   : > { %3068 = vmatmul.msk.bf16.gmra.mxu0 %vm477_vm0, %v4311_v39 }
  0x5c   : > { %3070 = vmatmul.msk.bf16.gmra.mxu1 %vm477_vm0, %v4311_v39  ;;  %3072 = vmatmul.msk.bf16.gmra.mxu2 %vm477_vm0, %v4311_v39 }
  0x5d   : > { %3074 = vmatmul.msk.bf16.gmra.mxu3 %vm477_vm0, %v4311_v39 }
  0x6b   : > { %3171 = vmatmul.msk.bf16.vlgmr.msra.gmra.mxu0 %vm477_vm0, %v4231_v11 }
  0x6c   : > { %3173 = vmatmul.msk.bf16.vlgmr.msra.gmra.mxu1 %vm477_vm0, %v4231_v11  ;;  %3175 = vmatmul.msk.bf16.vlgmr.msra.gmra.mxu2 %vm477_vm0, %v4231_v11 }
  0x6d   : > { %3177 = vmatmul.msk.bf16.vlgmr.msra.gmra.mxu3 %vm477_vm0, %v4231_v11  ;;  %957 = vmatpush.bf16.msra.mxu2 %v4256_v20  ;;  %v290_v20 = vunpack.c.l.bf16 %v4206_v0  ;;  %v292_v0 = vunpack.c.l.bf16 %v4286_v30 }
  0x6e   : > { %976 = vmatpush.bf16.msra.mxu3 %v4267_v24  ;;  %919 = vmatpush.bf16.msra.mxu0 %v4269_v25 }
  0x6f   : > { %938 = vmatpush.bf16.msra.mxu1 %v4289_v31  ;;  %v294_v25 = vsub.f32 %v4198_v61, %v290_v20 }
  0x71   : > { %958 = vmatpush.bf16.msra.mxu2 %v4302_v35 }
  0x72   : > { %977 = vmatpush.bf16.msra.mxu3 %v4304_v36  ;;  %920 = vmatpush.bf16.msra.mxu0 %v4330_v43 }
  0x73   : > { %939 = vmatpush.bf16.msra.mxu1 %v4341_v47 }
  0x75   : > { %959 = vmatpush.bf16.msra.mxu2 %v4343_v48  ;;  %v296_v48 = vsub.f32 %v4241_v16, %v292_v0  ;;  %v3824_v0 = vld [vmem:[%s5840_s5 + $0xb0] sm:$0xff] }
  0x76   : > { %978 = vmatpush.bf16.msra.mxu3 %v4355_v52  ;;  %921 = vmatpush.bf16.msra.mxu0 %v4368_v56 }
  0x77   : > { %940 = vmatpush.bf16.msra.mxu1 %v4370_v57 }
  0x7b   : > { %3172 = vmatmul.msk.bf16.gmra.mxu0 %vm477_vm0, %v4311_v39 }
  0x7c   : > { %3174 = vmatmul.msk.bf16.gmra.mxu1 %vm477_vm0, %v4311_v39  ;;  %3176 = vmatmul.msk.bf16.gmra.mxu2 %vm477_vm0, %v4311_v39 }
  0x7d   : > { %3178 = vmatmul.msk.bf16.gmra.mxu3 %vm477_vm0, %v4311_v39 }
  0x8b   : > { %3179 = vmatmul.msk.bf16.vlgmr.msrb.gmra.mxu0 %vm477_vm0, %v4231_v11 }
  0x8c   : > { %3181 = vmatmul.msk.bf16.vlgmr.msrb.gmra.mxu1 %vm477_vm0, %v4231_v11  ;;  %3183 = vmatmul.msk.bf16.vlgmr.msrb.gmra.mxu2 %vm477_vm0, %v4231_v11 }
  0x8d   : > { %3185 = vmatmul.msk.bf16.vlgmr.msrb.gmra.mxu3 %vm477_vm0, %v4231_v11  ;;  %1033 = vmatpush.bf16.msrb.mxu2 %v4392_v1  ;;  %v289_v11 = vunpack.c.l.bf16 %v4202_v63  ;;  %v291_v63 = vunpack.c.l.bf16 %v4282_v29 }
  0x8e   : > { %1052 = vmatpush.bf16.msrb.mxu3 %v4403_v5  ;;  %995 = vmatpush.bf16.msrb.mxu0 %v4405_v6 }
  0x8f   : > { %1014 = vmatpush.bf16.msrb.mxu1 %v4417_v10  ;;  %v293_v24 = vsub.f32 %v4195_v60, %v289_v11  ;;  %v295_v47 = vsub.f32 %v4238_v15, %v291_v63 }
  0x91   : > { %1034 = vmatpush.bf16.msrb.mxu2 %v3134_v17  ;;  %v297_v31 = vpack.c.bf16 %v294_v25, %v293_v24  ;;  %v298_v51 = vpack.c.bf16 %v296_v48, %v295_v47  ;;  %v3808_v24 = vld [vmem:[%s5840_s5 + $0x30] sm:$0xff] }
  0x92   : > { %1053 = vmatpush.bf16.msrb.mxu3 %v3138_v18  ;;  %996 = vmatpush.bf16.msrb.mxu0 %v3126_v23  ;;  %v3816_v25 = vld [vmem:[%s5840_s5 + $0x70] sm:$0xff] }
  0x93   : > { %1015 = vmatpush.bf16.msrb.mxu1 %v3130_v32  ;;  %v3832_v47 = vld [vmem:[%s5840_s5 + $0xf0] sm:$0xff] }
  0x95   : > { %1035 = vmatpush.bf16.msrb.mxu2 %v3102_v33 }
  0x96   : > { %1054 = vmatpush.bf16.msrb.mxu3 %v3106_v40  ;;  %997 = vmatpush.bf16.msrb.mxu0 %v3094_v45  ;;  %v3809_v40 = vld [vmem:[%s5840_s5 + $0x38] sm:$0xff] }
  0x97   : > { %1016 = vmatpush.bf16.msrb.mxu1 %v3098_v46 }
  0x9b   : > { %3180 = vmatmul.msk.bf16.gmra.mxu0 %vm477_vm0, %v4311_v39 }
  0x9c   : > { %3182 = vmatmul.msk.bf16.gmra.mxu1 %vm477_vm0, %v4311_v39  ;;  %3184 = vmatmul.msk.bf16.gmra.mxu2 %vm477_vm0, %v4311_v39 }
  0x9d   : > { %3186 = vmatmul.msk.bf16.gmra.mxu3 %vm477_vm0, %v4311_v39 }
  0xa8   : > { %v493_v35 = vpop.f32.mrf.mxu0 }
  0xa9   : > { %v512_v36 = vpop.f32.mrf.mxu1 }
  0xab   : > { %3187 = vmatmul.msk.bf16.vlgmr.msra.gmra.mxu0 %vm477_vm0, %v297_v31 }
  0xac   : > { %3189 = vmatmul.msk.bf16.vlgmr.msra.gmra.mxu1 %vm477_vm0, %v297_v31  ;;  %3191 = vmatmul.msk.bf16.vlgmr.msra.gmra.mxu2 %vm477_vm0, %v297_v31 }
  0xad   : > { %3193 = vmatmul.msk.bf16.vlgmr.msra.gmra.mxu3 %vm477_vm0, %v297_v31  ;;  %1961 = vmatpush.bf16.msra.mxu0 %v3809_v40 }
  0xae   : > { %1980 = vmatpush.bf16.msra.mxu1 %v3817_v41 }
  0xaf   : > { %v531_v39 = vpop.f32.mrf.mxu2 }
  0xb0   : > { %v550_v43 = vpop.f32.mrf.mxu3  ;;  %v4533_v60 = vpop.f32.mrf.mxu0 }
  0xb1   : > { %v4535_v61 = vpop.f32.mrf.mxu1  ;;  %1962 = vmatpush.bf16.msra.mxu0 %v3808_v24  ;;  %v3804_v24 = vld [vmem:[%s5840_s5 + $0x10] sm:$0xff] }
  0xb2   : > { %1981 = vmatpush.bf16.msra.mxu1 %v3816_v25  ;;  %v3829_v25 = vld [vmem:[%s5840_s5 + $0xd8] sm:$0xff] }
  0xb7   : > { %v4539_v49 = vpop.f32.mrf.mxu2 }
  0xb8   : > { %v4541_v50 = vpop.f32.mrf.mxu3  ;;  %v498_v52 = vpop.f32.mrf.mxu0 }
  0xb9   : > { %v517_v53 = vpop.f32.mrf.mxu1 }
  0xbb   : > { %3188 = vmatmul.msk.bf16.gmra.mxu0 %vm477_vm0, %v298_v51 }
  0xbc   : > { %3190 = vmatmul.msk.bf16.gmra.mxu1 %vm477_vm0, %v298_v51  ;;  %3192 = vmatmul.msk.bf16.gmra.mxu2 %vm477_vm0, %v298_v51 }
  0xbd   : > { %3194 = vmatmul.msk.bf16.gmra.mxu3 %vm477_vm0, %v298_v51 }
  0xbf   : > { %v536_v29 = vpop.f32.mrf.mxu2 }
  0xc0   : > { %v555_v30 = vpop.f32.mrf.mxu3  ;;  %v4547_v15 = vpop.f32.mrf.mxu0 }
  0xc1   : > { %v4549_v16 = vpop.f32.mrf.mxu1 }
  0xc7   : > { %v4551_v54 = vpop.f32.mrf.mxu2 }
  0xc8   : > { %v4553_v55 = vpop.f32.mrf.mxu3  ;;  %v4555_v56 = vpop.f32.mrf.mxu0 }
  0xc9   : > { %v4557_v57 = vpop.f32.mrf.mxu1 }
  0xcb   : > { %3195 = vmatmul.msk.bf16.vlgmr.msrb.gmra.mxu0 %vm477_vm0, %v297_v31 }
  0xcc   : > { %3197 = vmatmul.msk.bf16.vlgmr.msrb.gmra.mxu1 %vm477_vm0, %v297_v31  ;;  %3199 = vmatmul.msk.bf16.vlgmr.msrb.gmra.mxu2 %vm477_vm0, %v297_v31 }
  0xcd   : > { %3201 = vmatmul.msk.bf16.vlgmr.msrb.gmra.mxu3 %vm477_vm0, %v297_v31  ;;  %v3825_v31 = vld [vmem:[%s5840_s5 + $0xb8] sm:$0xff] }
  0xce   : > { %1999 = vmatpush.bf16.msra.mxu2 %v3825_v31  ;;  %v3803_v31 = vld [vmem:[%s5840_s5 + $0x8] sm:$0xff] }
  0xcf   : > { %v4563_v58 = vpop.f32.mrf.mxu2 }
  0xd0   : > { %v4565_v59 = vpop.f32.mrf.mxu3  ;;  %v4567_v62 = vpop.f32.mrf.mxu0 }
  0xd1   : > { %v4569_v1 = vpop.f32.mrf.mxu1 }
  0xd2   : > { %2000 = vmatpush.bf16.msra.mxu2 %v3824_v0 }
  0xd7   : > { %v4571_v2 = vpop.f32.mrf.mxu2 }
  0xd8   : > { %v4573_v3 = vpop.f32.mrf.mxu3  ;;  %v4575_v4 = vpop.f32.mrf.mxu0 }
  0xd9   : > { %v4577_v5 = vpop.f32.mrf.mxu1 }
  0xdb   : > { %3196 = vmatmul.msk.bf16.gmra.mxu0 %vm477_vm0, %v298_v51 }
  0xdc   : > { %3198 = vmatmul.msk.bf16.gmra.mxu1 %vm477_vm0, %v298_v51  ;;  %3200 = vmatmul.msk.bf16.gmra.mxu2 %vm477_vm0, %v298_v51 }
  0xdd   : > { %3202 = vmatmul.msk.bf16.gmra.mxu3 %vm477_vm0, %v298_v51 }
  0xdf   : > { %v4583_v6 = vpop.f32.mrf.mxu2 }
  0xe0   : > { %v4585_v7 = vpop.f32.mrf.mxu3  ;;  %v4587_v8 = vpop.f32.mrf.mxu0 }
  0xe1   : > { %v4589_v9 = vpop.f32.mrf.mxu1 }
  0xe7   : > { %v4591_v10 = vpop.f32.mrf.mxu2 }
  0xe8   : > { %v4593_v12 = vpop.f32.mrf.mxu3  ;;  %v765_v13 = vpop.f32.mrf.mxu0 }
  0xe9   : > { %5897 = vst [vmem:[#allocation6_spill] sm:$0xff] %v4593_v12  ;;  %v784_v14 = vpop.f32.mrf.mxu1  ;;  %v4595_v17 = vadd.f32 %v765_v13, %v493_v35  ;;  %v3833_v35 = vld [vmem:[%s5840_s5 + $0xf8] sm:$0xff] }
  0xea   : > { %v4597_v18 = vadd.f32 %v784_v14, %v512_v36  ;;  %2018 = vmatpush.bf16.msra.mxu3 %v3833_v35  ;;  %v3807_v36 = vld [vmem:[%s5840_s5 + $0x28] sm:$0xff]  ;;  %v3805_v13 = vld [vmem:[%s5840_s5 + $0x18] sm:$0xff] }
  0xeb   : > { %1963 = vmatpush.bf16.msra.mxu0 %v3807_v36  ;;  %v3813_v14 = vld [vmem:[%s5840_s5 + $0x58] sm:$0xff]  ;;  %v3811_v35 = vld [vmem:[%s5840_s5 + $0x48] sm:$0xff] }
  0xec   : > { %v3837_v12 = vld [vmem:[%s5840_s5 + $0x118] sm:$0xff] }
  0xee   : > { %2019 = vmatpush.bf16.msra.mxu3 %v3832_v47 }
  0xef   : > { %v803_v19 = vpop.f32.mrf.mxu2 }
  0xf0   : > { %v822_v21 = vpop.f32.mrf.mxu3  ;;  %v4599_v22 = vadd.f32 %v803_v19, %v531_v39  ;;  %v4603_v26 = vpop.f32.mrf.mxu0  ;;  %v3815_v39 = vld [vmem:[%s5840_s5 + $0x68] sm:$0xff] }
  0xf1   : > { %v4601_v23 = vadd.f32 %v822_v21, %v550_v43  ;;  %v4605_v27 = vpop.f32.mrf.mxu1  ;;  %1982 = vmatpush.bf16.msra.mxu1 %v3815_v39 }
  0xf7   : > { %v4607_v28 = vpop.f32.mrf.mxu2 }
  0xf8   : > { %v4609_v32 = vpop.f32.mrf.mxu3  ;;  %v770_v33 = vpop.f32.mrf.mxu0 }
  0xf9   : > { %v789_v34 = vpop.f32.mrf.mxu1  ;;  %v4611_v37 = vadd.f32 %v770_v33, %v498_v52  ;;  %v3822_v33 = vld [vmem:[%s5840_s5 + $0xa0] sm:$0xff] }
  0xfa   : > { %v4613_v38 = vadd.f32 %v789_v34, %v517_v53 }
  0xff   : > { %v808_v42 = vpop.f32.mrf.mxu2 }
 0x100   : > { %v827_v44 = vpop.f32.mrf.mxu3  ;;  %v4621_v45 = vadd.f32 %v808_v42, %v536_v29  ;;  %v4625_v11 = vpop.f32.mrf.mxu0  ;;  %v3806_v29 = vld [vmem:[%s5840_s5 + $0x20] sm:$0xff] }
 0x101   : > { %v4623_v46 = vadd.f32 %v827_v44, %v555_v30  ;;  %v4627_v20 = vpop.f32.mrf.mxu1  ;;  %v3814_v30 = vld [vmem:[%s5840_s5 + $0x60] sm:$0xff]  ;;  %1964 = vmatpush.bf16.msra.mxu0 %v3806_v29 }
 0x102   : > { %1983 = vmatpush.bf16.msra.mxu1 %v3814_v30  ;;  %v3830_v44 = vld [vmem:[%s5840_s5 + $0xe0] sm:$0xff] }
 0x105   : > { %1965 = vmatpush.bf16.msra.mxu0 %v3805_v13 }
 0x106   : > { %1984 = vmatpush.bf16.msra.mxu1 %v3813_v14 }
 0x107   : > { %v4647_v43 = vpop.f32.mrf.mxu2 }
 0x108   : > { %v4649_v63 = vpop.f32.mrf.mxu3  ;;  %v841_v48 = vpop.f32.mrf.mxu0 }
 0x109   : > { %v860_v51 = vpop.f32.mrf.mxu1  ;;  %v4658_v52 = vadd.f32 %v841_v48, %v4555_v56  ;;  %v3823_v56 = vld [vmem:[%s5840_s5 + $0xa8] sm:$0xff]  ;;  %1966 = vmatpush.bf16.msra.mxu0 %v3804_v24  ;;  %v3820_v48 = vld [vmem:[%s5840_s5 + $0x90] sm:$0xff] }
 0x10a   : > { %v4661_v53 = vadd.f32 %v860_v51, %v4557_v57  ;;  %v3831_v57 = vld [vmem:[%s5840_s5 + $0xe8] sm:$0xff]  ;;  %2001 = vmatpush.bf16.msra.mxu2 %v3823_v56  ;;  %v3828_v51 = vld [vmem:[%s5840_s5 + $0xd0] sm:$0xff]  ;;  %v3802_v56 = vld [vmem:[%s5840_s5] sm:$0xff] }
 0x10b   : > { %2020 = vmatpush.bf16.msra.mxu3 %v3831_v57  ;;  %v3810_v57 = vld [vmem:[%s5840_s5 + $0x40] sm:$0xff] }
 0x10d   : > { %1967 = vmatpush.bf16.msra.mxu0 %v3803_v31  ;;  %v4774_v31 = vld [vmem:[%s5838_s3] sm:$0xff] }
 0x10e   : > { %2002 = vmatpush.bf16.msra.mxu2 %v3822_v33 }
 0x10f   : > { %v879_v19 = vpop.f32.mrf.mxu2  ;;  %2021 = vmatpush.bf16.msra.mxu3 %v3830_v44 }
 0x110   : > { %v898_v21 = vpop.f32.mrf.mxu3  ;;  %v4685_v34 = vadd.f32 %v879_v19, %v4563_v58  ;;  %v4690_v41 = vpop.f32.mrf.mxu0  ;;  %v3812_v58 = vld [vmem:[%s5840_s5 + $0x50] sm:$0xff]  ;;  %v3841_v19 = vld [vmem:[%s5840_s5 + $0x138] sm:$0xff] }
 0x111   : > { %v4688_v40 = vadd.f32 %v898_v21, %v4565_v59  ;;  %v4692_v42 = vpop.f32.mrf.mxu1  ;;  %1985 = vmatpush.bf16.msra.mxu1 %v3812_v58  ;;  %v3821_v59 = vld [vmem:[%s5840_s5 + $0x98] sm:$0xff]  ;;  %1968 = vmatpush.bf16.msra.mxu0 %v3802_v56 }
 0x112   : > { %2003 = vmatpush.bf16.msra.mxu2 %v3821_v59  ;;  %v3849_v21 = vld [vmem:[%s5840_s5 + $0x178] sm:$0xff]  ;;  %v3818_v59 = vld [vmem:[%s5840_s5 + $0x80] sm:$0xff] }
 0x113   : > { %2022 = vmatpush.bf16.msra.mxu3 %v3829_v25  ;;  %v3826_v25 = vld [vmem:[%s5840_s5 + $0xc0] sm:$0xff] }
 0x115   : > { %1986 = vmatpush.bf16.msra.mxu1 %v3811_v35  ;;  %2037 = vmatpush.bf16.msrb.mxu0 %v3841_v19  ;;  %v3857_v35 = vld [vmem:[%s5840_s5 + $0x1b8] sm:$0xff] }
 0x116   : > { %2004 = vmatpush.bf16.msra.mxu2 %v3820_v48  ;;  %v4784_v48 = vperm.slane %v4774_v31, 0  ;;  %v3861_v19 = vld [vmem:[%s5840_s5 + $0x1d8] sm:$0xff] }
 0x117   : > { %v4715_v36 = vpop.f32.mrf.mxu2  ;;  %2023 = vmatpush.bf16.msra.mxu3 %v3828_v51  ;;  %v4787_v51 = vperm.slane %v4774_v31, 1 }
 0x118   : > { %v4717_v39 = vpop.f32.mrf.mxu3  ;;  %v846_v0 = vpop.f32.mrf.mxu0 }
 0x119   : > { %v865_v47 = vpop.f32.mrf.mxu1  ;;  %v4726_v29 = vadd.f32 %v846_v0, %v4575_v4  ;;  %1987 = vmatpush.bf16.msra.mxu1 %v3810_v57  ;;  %v3819_v4 = vld [vmem:[%s5840_s5 + $0x88] sm:$0xff] }
 0x11a   : > { %v4729_v30 = vadd.f32 %v865_v47, %v4577_v5  ;;  %v3827_v5 = vld [vmem:[%s5840_s5 + $0xc8] sm:$0xff]  ;;  %2005 = vmatpush.bf16.msra.mxu2 %v3819_v4 }
 0x11b   : > { %2024 = vmatpush.bf16.msra.mxu3 %v3827_v5  ;;  %v3839_v4 = vld [vmem:[%s5840_s5 + $0x128] sm:$0xff] }
 0x11c   : > { %v3847_v5 = vld [vmem:[%s5840_s5 + $0x168] sm:$0xff] }
 0x11d   : > { %2056 = vmatpush.bf16.msrb.mxu1 %v3849_v21  ;;  %v3856_v21 = vld [vmem:[%s5840_s5 + $0x1b0] sm:$0xff] }
 0x11e   : > { %2006 = vmatpush.bf16.msra.mxu2 %v3818_v59 }
 0x11f   : > { %v884_v13 = vpop.f32.mrf.mxu2  ;;  %2025 = vmatpush.bf16.msra.mxu3 %v3826_v25 }
 0x120   : > { %v903_v14 = vpop.f32.mrf.mxu3  ;;  %v4750_v33 = vadd.f32 %v884_v13, %v4583_v6  ;;  %v4755_v24 = vpop.f32.mrf.mxu0  ;;  %v3840_v6 = vld [vmem:[%s5840_s5 + $0x130] sm:$0xff] }
 0x121   : > { %v4753_v44 = vadd.f32 %v903_v14, %v4585_v7  ;;  %v4757_v58 = vpop.f32.mrf.mxu1  ;;  %v3848_v7 = vld [vmem:[%s5840_s5 + $0x170] sm:$0xff]  ;;  %2038 = vmatpush.bf16.msrb.mxu0 %v3840_v6 }
 0x122   : > { %2057 = vmatpush.bf16.msrb.mxu1 %v3848_v7  ;;  %2075 = vmatpush.bf16.msrb.mxu2 %v3857_v35  ;;  %v4812_v35 = vperm.slane %v4774_v31, 2 }
 0x123   : > { %2098 = vmatpush.bf16.msrb.mxu3 %v3861_v19  ;;  %v787_v19 = vadd.f32 %v4605_v27, %v4535_v61 }
 0x125   : > { %2039 = vmatpush.bf16.msrb.mxu0 %v3839_v4 }
 0x126   : > { %2058 = vmatpush.bf16.msrb.mxu1 %v3847_v5  ;;  %2076 = vmatpush.bf16.msrb.mxu2 %v3856_v21 }
 0x127   : > { %v4779_v0 = vpop.f32.mrf.mxu2 }
 0x128   : > { %5898 = vst [vmem:[#allocation7_spill] sm:$0xff] %v4779_v0  ;;  %v4781_v47 = vpop.f32.mrf.mxu3  ;;  %v923_v56 = vpop.f32.mrf.mxu0 }
 0x129   : > { %5899 = vst [vmem:[#allocation8_spill] sm:$0xff] %v4781_v47  ;;  %v942_v57 = vpop.f32.mrf.mxu1  ;;  %v1066_v13 = vadd.f32 %v923_v56, %v4595_v17  ;;  %v3838_v17 = vld [vmem:[%s5840_s5 + $0x120] sm:$0xff]  ;;  %v4815_v56 = vperm.slane %v4774_v31, 3 }
 0x12a   : > { %v1067_v14 = vadd.f32 %v942_v57, %v4597_v18  ;;  %v3846_v18 = vld [vmem:[%s5840_s5 + $0x160] sm:$0xff]  ;;  %2040 = vmatpush.bf16.msrb.mxu0 %v3838_v17  ;;  %v3855_v57 = vld [vmem:[%s5840_s5 + $0x1a8] sm:$0xff] }
 0x12b   : > { %v1116_v59 = vadd.f32 %v4784_v48, %v1066_v13  ;;  %2059 = vmatpush.bf16.msrb.mxu1 %v3846_v18  ;;  %2077 = vmatpush.bf16.msrb.mxu2 %v3855_v57  ;;  %v3860_v57 = vld [vmem:[%s5840_s5 + $0x1d0] sm:$0xff] }
 0x12c   : > { %v1117_v25 = vadd.f32 %v4787_v51, %v1067_v14  ;;  %v768_v14 = vadd.f32 %v4603_v26, %v4533_v60  ;;  %v3845_v60 = vld [vmem:[%s5840_s5 + $0x158] sm:$0xff]  ;;  %2099 = vmatpush.bf16.msrb.mxu3 %v3860_v57 }
 0x12d   : > { %v1148_v6 = vmax.f32 %v1116_v59, 0.0 }
 0x12e   : > { %v1149_v7 = vmax.f32 %v1117_v25, 0.0  ;;  %2041 = vmatpush.bf16.msrb.mxu0 %v3837_v12  ;;  %v4856_v12 = vadd.f32 %v4625_v11, %v4547_v15  ;;  %v4872_v15 = vadd.f32 %v4647_v43, %v4551_v54  ;;  %v4876_v11 = vadd.f32 %v4649_v63, %v4553_v55 }
 0x12f   : > { %v961_v5 = vpop.f32.mrf.mxu2  ;;  %2060 = vmatpush.bf16.msrb.mxu1 %v3845_v60  ;;  %v4887_v54 = vadd.f32 %v4692_v42, %v4569_v1  ;;  %v3843_v1 = vld [vmem:[%s5840_s5 + $0x148] sm:$0xff] }
 0x130   : > { %v4820_v4 = vpack.c.bf16 %v1149_v7, %v1148_v6  ;;  %v980_v13 = vpop.f32.mrf.mxu3  ;;  %v1068_v21 = vadd.f32 %v961_v5, %v4599_v22  ;;  %v925_v25 = vpop.f32.mrf.mxu0  ;;  %v3854_v5 = vld [vmem:[%s5840_s5 + $0x1a0] sm:$0xff] }
 0x131   : > { %v1069_v59 = vadd.f32 %v980_v13, %v4601_v23  ;;  %v944_v17 = vpop.f32.mrf.mxu1  ;;  %v1074_v23 = vadd.f32 %v925_v25, %v768_v14  ;;  %2078 = vmatpush.bf16.msrb.mxu2 %v3854_v5  ;;  %v4880_v25 = vadd.f32 %v4690_v41, %v4567_v62 }
 0x132   : > { %v1196_v18 = vunpack.c.l.bf16 %v4820_v4  ;;  %v1197_v47 = vunpack.c.h.bf16 %v4820_v4  ;;  %v1118_v61 = vadd.f32 %v4812_v35, %v1068_v21  ;;  %v1075_v26 = vadd.f32 %v944_v17, %v787_v19  ;;  %v3844_v19 = vld [vmem:[%s5840_s5 + $0x150] sm:$0xff] }
 0x133   : > { %v1119_v22 = vadd.f32 %v4815_v56, %v1069_v59  ;;  %v1124_v59 = vadd.f32 %v4784_v48, %v1074_v23  ;;  %2061 = vmatpush.bf16.msrb.mxu1 %v3844_v19  ;;  %v3835_v23 = vld [vmem:[%s5840_s5 + $0x108] sm:$0xff]  ;;  %v1533_v42 = vunpack.c.h.b16 %v4820_v4 }
 0x134   : > { %v4838_v27 = vsub.f32 %v1149_v7, %v1197_v47  ;;  %v4846_v13 = vsub.f32 %v1148_v6, %v1196_v18  ;;  %v1150_v0 = vmax.f32 %v1118_v61, 0.0  ;;  %v1125_v14 = vadd.f32 %v4787_v51, %v1075_v26  ;;  %v3836_v6 = vld [vmem:[%s5840_s5 + $0x110] sm:$0xff] }
 0x135   : > { %v1151_v21 = vmax.f32 %v1119_v22, 0.0  ;;  %v806_v47 = vadd.f32 %v4607_v28, %v4539_v49  ;;  %v825_v7 = vadd.f32 %v4609_v32, %v4541_v50  ;;  %v4866_v49 = vadd.f32 %v4627_v20, %v4549_v16  ;;  %2042 = vmatpush.bf16.msrb.mxu0 %v3836_v6  ;;  %v3853_v16 = vld [vmem:[%s5840_s5 + $0x198] sm:$0xff] }
 0x136   : > { %5900 = vst [vmem:[#allocation9_spill] sm:$0xff] %v4838_v27  ;;  %v1156_v50 = vmax.f32 %v1124_v59, 0.0  ;;  %v1157_v32 = vmax.f32 %v1125_v14, 0.0  ;;  %v1532_v20 = vunpack.c.l.b16 %v4820_v4  ;;  %2079 = vmatpush.bf16.msrb.mxu2 %v3853_v16  ;;  %v3842_v16 = vld [vmem:[%s5840_s5 + $0x140] sm:$0xff] }
 0x137   : > { %5901 = vst [vmem:[#allocation10_spill] sm:$0xff] %v4846_v13  ;;  %v4868_v28 = vpack.c.bf16 %v1151_v21, %v1150_v0  ;;  %v963_v17 = vpop.f32.mrf.mxu2  ;;  %2062 = vmatpush.bf16.msrb.mxu1 %v3843_v1 }
 0x138   : > { %v982_v18 = vpop.f32.mrf.mxu3  ;;  %v928_v62 = vpop.f32.mrf.mxu0  ;;  %v1184_v41 = vpack.c.bf16 %v1157_v32, %v1156_v50  ;;  %v1076_v60 = vadd.f32 %v963_v17, %v806_v47 }
 0x139   : > { %v1198_v55 = vunpack.c.l.bf16 %v4868_v28  ;;  %v1199_v43 = vunpack.c.h.bf16 %v4868_v28  ;;  %v947_v63 = vpop.f32.mrf.mxu1  ;;  %v1077_v61 = vadd.f32 %v982_v18, %v825_v7  ;;  %v1082_v22 = vadd.f32 %v928_v62, %v4611_v37  ;;  %2043 = vmatpush.bf16.msrb.mxu0 %v3835_v23  ;;  %v3852_v7 = vld [vmem:[%s5840_s5 + $0x190] sm:$0xff]  ;;  %v3834_v18 = vld [vmem:[%s5840_s5 + $0x100] sm:$0xff] }
 0x13a   : > { %v1083_v57 = vadd.f32 %v947_v63, %v4613_v38  ;;  %v1204_v59 = vunpack.c.l.bf16 %v1184_v41  ;;  %v1205_v14 = vunpack.c.h.bf16 %v1184_v41  ;;  %v4906_v37 = vadd.f32 %v4812_v35, %v1076_v60  ;;  %2080 = vmatpush.bf16.msrb.mxu2 %v3852_v7 }
 0x13b   : > { %v4900_v26 = vsub.f32 %v1151_v21, %v1199_v43  ;;  %v4903_v5 = vsub.f32 %v1150_v0, %v1198_v55  ;;  %v1127_v47 = vadd.f32 %v4815_v56, %v1077_v61  ;;  %v4913_v4 = vadd.f32 %v4784_v48, %v1082_v22  ;;  %2063 = vmatpush.bf16.msrb.mxu1 %v3842_v16 }
 0x13c   : > { %v1133_v38 = vadd.f32 %v4787_v51, %v1083_v57  ;;  %v1540_v0 = vunpack.c.l.b16 %v1184_v41  ;;  %v1541_v21 = vunpack.c.h.b16 %v1184_v41  ;;  %v4916_v6 = vsub.f32 %v1157_v32, %v1205_v14 }
 0x13d   : > { %5902 = vst [vmem:[#allocation11_spill] sm:$0xff] %v4900_v26  ;;  %v1158_v19 = vmax.f32 %v4906_v37, 0.0  ;;  %v1159_v17 = vmax.f32 %v1127_v47, 0.0  ;;  %v4925_v55 = vsub.f32 %v1156_v50, %v1204_v59  ;;  %v5846_v43 = vmax.f32 %v4913_v4, 0.0  ;;  %v3859_v50 = vld [vmem:[%s5840_s5 + $0x1c8] sm:$0xff]  ;;  %2044 = vmatpush.bf16.msrb.mxu0 %v3834_v18  ;;  %v4959_v18 = vld [vmem:[%s5839_s4 + $0x38] sm:$0xff] }
 0x13e   : > { %5903 = vst [vmem:[#allocation12_spill] sm:$0xff] %v4903_v5  ;;  %v1165_v62 = vmax.f32 %v1133_v38, 0.0  ;;  %v4928_v63 = vpack.c.b16 %v1540_v0, %v1532_v20  ;;  %v4930_v32 = vpack.c.b16 %v1541_v21, %v1533_v42  ;;  %v1534_v41 = vunpack.c.l.b16 %v4868_v28  ;;  %v3851_v20 = vld [vmem:[%s5840_s5 + $0x188] sm:$0xff]  ;;  %2100 = vmatpush.bf16.msrb.mxu3 %v3859_v50  ;;  %v5038_v37 = vld [vmem:[%s5839_s4 + $0xb8] sm:$0xff] }
 0x13f   : > { %5904 = vst [vmem:[#allocation13_spill] sm:$0xff] %v4916_v6  ;;  %v1185_v61 = vpack.c.bf16 %v1159_v17, %v1158_v19  ;;  %v966_v22 = vpop.f32.mrf.mxu2  ;;  %v1535_v42 = vunpack.c.h.b16 %v4868_v28  ;;  %2081 = vmatpush.bf16.msrb.mxu2 %v3851_v20 }
 0x140   : > { %5905 = vst [vmem:[#allocation14_spill] sm:$0xff] %v4925_v55  ;;  %v985_v23 = vpop.f32.mrf.mxu3  ;;  %v4948_v57 = vpack.c.bf16 %v1165_v62, %v5846_v43  ;;  %1969 = vmatmul.bf16.vlgmr.msra.gmra.mxu0 %v4928_v63  ;;  %1988 = vmatmul.bf16.vlgmr.msra.gmra.mxu1 %v4930_v32  ;;  %v1084_v59 = vadd.f32 %v966_v22, %v4621_v45  ;;  %v930_v47 = vpop.f32.mrf.mxu0  ;;  %v4964_v45 = vld [vmem:[%s5839_s4 + $0x78] sm:$0xff] }
 0x141   : > { %v1085_v14 = vadd.f32 %v985_v23, %v4623_v46  ;;  %v949_v7 = vpop.f32.mrf.mxu1  ;;  %v1206_v38 = vunpack.c.l.bf16 %v1185_v61  ;;  %v1207_v0 = vunpack.c.h.bf16 %v1185_v61  ;;  %v1090_v21 = vadd.f32 %v930_v47, %v4856_v12  ;;  %v3858_v47 = vld [vmem:[%s5840_s5 + $0x1c0] sm:$0xff]  ;;  %2473 = vmatpush.bf16.msra.mxu0 %v4959_v18  ;;  %2492 = vmatpush.bf16.msra.mxu1 %v4964_v45 }
 0x142   : > { %v1091_v28 = vadd.f32 %v949_v7, %v4866_v49  ;;  %v1213_v46 = vunpack.c.h.bf16 %v4948_v57  ;;  %v4968_v16 = vadd.f32 %v4812_v35, %v1084_v59  ;;  %v1542_v49 = vunpack.c.l.b16 %v1185_v61  ;;  %2101 = vmatpush.bf16.msrb.mxu3 %v3858_v47 }
 0x143   : > { %v1135_v12 = vadd.f32 %v4815_v56, %v1085_v14  ;;  %v4971_v22 = vsub.f32 %v1159_v17, %v1207_v0  ;;  %v4974_v23 = vadd.f32 %v4784_v48, %v1090_v21  ;;  %v1543_v20 = vunpack.c.h.b16 %v1185_v61  ;;  %v3850_v17 = vld [vmem:[%s5840_s5 + $0x180] sm:$0xff] }
 0x144   : > { %v4977_v50 = vadd.f32 %v4787_v51, %v1091_v28  ;;  %v4987_v59 = vsub.f32 %v1165_v62, %v1213_v46  ;;  %v5843_v48 = vmax.f32 %v4968_v16, 0.0  ;;  %v4990_v51 = vpack.c.b16 %v1542_v49, %v1534_v41  ;;  %2082 = vmatpush.bf16.msrb.mxu2 %v3850_v17  ;;  %v5001_v62 = vld [vmem:[%s5839_s4 + $0x30] sm:$0xff] }
 0x145   : > { %5906 = vst [vmem:[#allocation15_spill] sm:$0xff] %v4971_v22  ;;  %v1167_v14 = vmax.f32 %v1135_v12, 0.0  ;;  %v5845_v7 = vmax.f32 %v4974_v23, 0.0  ;;  %v4996_v21 = vpack.c.b16 %v1543_v20, %v1535_v42  ;;  %v5006_v41 = vld [vmem:[%s5839_s4 + $0x70] sm:$0xff]  ;;  %v5010_v28 = vadd.f32 %v4715_v36, %v4571_v2  ;;  %2474 = vmatpush.bf16.msra.mxu0 %v5001_v62 }
 0x146   : > { %5907 = vst [vmem:[#allocation16_spill] sm:$0xff] %v4987_v59  ;;  %v5844_v0 = vmax.f32 %v4977_v50, 0.0  ;;  %2007 = vmatmul.bf16.vlgmr.msra.gmra.mxu2 %v4990_v51  ;;  %v5018_v46 = vperm.slane %v4774_v31, 4  ;;  %v5022_v12 = vsub.f32 %v1158_v19, %v1206_v38  ;;  %v5030_v20 = vperm.slane %v4774_v31, 5  ;;  %v5043_v19 = vld [vmem:[%s5839_s4 + $0xf8] sm:$0xff]  ;;  %2493 = vmatpush.bf16.msra.mxu1 %v5006_v41 }
 0x147   : > { %v5014_v42 = vpack.c.bf16 %v1167_v14, %v5843_v48  ;;  %2026 = vmatmul.bf16.vlgmr.msra.gmra.mxu3 %v4996_v21  ;;  %v968_v2 = vpop.f32.mrf.mxu2  ;;  %v1548_v47 = vunpack.c.l.b16 %v4948_v57  ;;  %v1549_v17 = vunpack.c.h.b16 %v4948_v57 }
 0x148   : > { %5908 = vst [vmem:[#allocation17_spill] sm:$0xff] %v5022_v12  ;;  %v1192_v49 = vpack.c.bf16 %v5844_v0, %v5845_v7  ;;  %v987_v36 = vpop.f32.mrf.mxu3  ;;  %v1092_v61 = vadd.f32 %v968_v2, %v4872_v15  ;;  %v999_v1 = vpop.f32.mrf.mxu0  ;;  %v1212_v0 = vunpack.c.l.bf16 %v4948_v57  ;;  %2511 = vmatpush.bf16.msra.mxu2 %v5038_v37  ;;  %2530 = vmatpush.bf16.msra.mxu3 %v5043_v19  ;;  %v5057_v15 = vld [vmem:[%s5839_s4 + $0x28] sm:$0xff] }
 0x149   : > { %v1215_v38 = vunpack.c.h.bf16 %v5014_v42  ;;  %v1093_v60 = vadd.f32 %v987_v36, %v4876_v11  ;;  %v1018_v48 = vpop.f32.mrf.mxu1  ;;  %v1070_v7 = vadd.f32 %v999_v1, %v4658_v52  ;;  %v5062_v11 = vld [vmem:[%s5839_s4 + $0x68] sm:$0xff]  ;;  %v5066_v52 = vadd.f32 %v4717_v39, %v4573_v3  ;;  %2475 = vmatpush.bf16.msra.mxu0 %v5057_v15  ;;  %v5088_v3 = vld [vmem:[%s5839_s4 + $0xb0] sm:$0xff] }
 0x14a   : > { %v1071_v43 = vadd.f32 %v1018_v48, %v4661_v53  ;;  %v1556_v26 = vunpack.c.l.b16 %v1192_v49  ;;  %v1557_v22 = vunpack.c.h.b16 %v1192_v49  ;;  %v5071_v1 = vadd.f32 %v4812_v35, %v1092_v61  ;;  %v5093_v39 = vld [vmem:[%s5839_s4 + $0xf0] sm:$0xff]  ;;  %2494 = vmatpush.bf16.msra.mxu1 %v5062_v11  ;;  %v5111_v61 = vld [vmem:[%s5839_s4 + $0x60] sm:$0xff] }
 0x14b   : > { %v5068_v53 = vsub.f32 %v1167_v14, %v1215_v38  ;;  %v5074_v57 = vadd.f32 %v4815_v56, %v1093_v60  ;;  %v5077_v48 = vadd.f32 %v5018_v46, %v1070_v7  ;;  %v5106_v14 = vld [vmem:[%s5839_s4 + $0x20] sm:$0xff]  ;;  %5912 = vst [vmem:[#allocation21_spill] sm:$0xff] %v5111_v61  ;;  %v5913_v7 = vmax.f32 %v4913_v4, 0.0 }
 0x14c   : > { %v1121_v2 = vadd.f32 %v5030_v20, %v1071_v43  ;;  %v5080_v36 = vpack.c.b16 %v1556_v26, %v1548_v47  ;;  %v5082_v27 = vpack.c.b16 %v1557_v22, %v1549_v17  ;;  %v5852_v35 = vmax.f32 %v5071_v1, 0.0  ;;  %2512 = vmatpush.bf16.msra.mxu2 %v5088_v3  ;;  %2531 = vmatpush.bf16.msra.mxu3 %v5093_v39 }
 0x14d   : > { %5909 = vst [vmem:[#allocation18_spill] sm:$0xff] %v5068_v53  ;;  %v5851_v56 = vmax.f32 %v5074_v57, 0.0  ;;  %v1220_v43 = vunpack.c.l.bf16 %v1192_v49  ;;  %v5115_v47 = vsub.f32 %v5913_v7, %v1212_v0  ;;  %v1221_v17 = vunpack.c.h.bf16 %v1192_v49  ;;  %2476 = vmatpush.bf16.msra.mxu0 %v5106_v14 }
 0x14e   : > { %5910 = vst [vmem:[#allocation19_spill] sm:$0xff] %v5082_v27  ;;  %v1153_v22 = vmax.f32 %v1121_v2, 0.0  ;;  %v5124_v2 = vperm.slane %v4774_v31, 6  ;;  %v5127_v26 = vperm.slane %v4774_v31, 7  ;;  %v5915_v60 = vmax.f32 %v4974_v23, 0.0  ;;  %v5146_v31 = vld [vmem:[%s5839_s4 + $0xa8] sm:$0xff]  ;;  %2495 = vmatpush.bf16.msra.mxu1 %v5111_v61 }
 0x14f   : > { %5911 = vst [vmem:[#allocation20_spill] sm:$0xff] %v5106_v14  ;;  %v5121_v38 = vpack.c.bf16 %v5851_v56, %v5852_v35  ;;  %v5135_v4 = vadd.f32 %v4755_v24, %v4587_v8  ;;  %v5917_v0 = vmax.f32 %v5077_v48, 0.0  ;;  %v1037_v7 = vpop.f32.mrf.mxu2  ;;  %v1550_v35 = vunpack.c.l.b16 %v5014_v42  ;;  %v5151_v8 = vld [vmem:[%s5839_s4 + $0xe8] sm:$0xff]  ;;  %v5189_v14 = vld [vmem:[%s5839_s4 + $0xa0] sm:$0xff] }
 0x150   : > { %5914 = vst [vmem:[#allocation22_spill] sm:$0xff] %v5115_v47  ;;  %v5131_v5 = vsub.f32 %v5915_v60, %v1220_v43  ;;  %v1056_v56 = vpop.f32.mrf.mxu3  ;;  %v5919_v24 = vmax.f32 %v4977_v50, 0.0  ;;  %1974 = vmatmul.bf16.gmra.mxu0 %v5080_v36  ;;  %1993 = vmatmul.bf16.gmra.mxu1 %v5082_v27  ;;  %v1072_v43 = vadd.f32 %v1037_v7, %v4685_v34  ;;  %v5171_v34 = vld [vmem:[%s5839_s4 + $0x18] sm:$0xff] }
 0x151   : > { %v5139_v49 = vpack.c.bf16 %v1153_v22, %v5917_v0  ;;  %5918 = vst [vmem:[#allocation24_spill] sm:$0xff] %v5146_v31  ;;  %v1073_v60 = vadd.f32 %v1056_v56, %v4688_v40  ;;  %v1001_v0 = vpop.f32.mrf.mxu0  ;;  %v1020_v12 = vpop.f32.mrf.mxu1  ;;  %v1558_v6 = vunpack.c.l.b16 %v5121_v38  ;;  %v1559_v13 = vunpack.c.h.b16 %v5121_v38  ;;  %2513 = vmatpush.bf16.msra.mxu2 %v5146_v31  ;;  %v5176_v40 = vld [vmem:[%s5839_s4 + $0x58] sm:$0xff]  ;;  %2532 = vmatpush.bf16.msra.mxu3 %v5151_v8 }
 0x152   : > { %5916 = vst [vmem:[#allocation23_spill] sm:$0xff] %v5131_v5  ;;  %v5155_v23 = vsub.f32 %v5919_v24, %v1221_v17  ;;  %v1551_v17 = vunpack.c.h.b16 %v5014_v42  ;;  %v1214_v56 = vunpack.c.l.bf16 %v5014_v42  ;;  %v5180_v7 = vadd.f32 %v5124_v2, %v1072_v43  ;;  %v5194_v42 = vld [vmem:[%s5839_s4 + $0xe0] sm:$0xff]  ;;  %2477 = vmatpush.bf16.msra.mxu0 %v5171_v34  ;;  %2496 = vmatpush.bf16.msra.mxu1 %v5176_v40 }
 0x153   : > { %v1200_v55 = vunpack.c.l.bf16 %v5139_v49  ;;  %v1201_v50 = vunpack.c.h.bf16 %v5139_v49  ;;  %v1123_v24 = vadd.f32 %v5127_v26, %v1073_v60  ;;  %v1078_v61 = vadd.f32 %v1001_v0, %v4880_v25  ;;  %5921 = vst [vmem:[#allocation26_spill] sm:$0xff] %v5194_v42  ;;  %v5206_v25 = vld [vmem:[%s5839_s4 + $0x10] sm:$0xff] }
 0x154   : > { %5920 = vst [vmem:[#allocation25_spill] sm:$0xff] %v5155_v23  ;;  %v1079_v31 = vadd.f32 %v1020_v12, %v4887_v54  ;;  %v5198_v27 = vpack.c.b16 %v1558_v6, %v1550_v35  ;;  %v5200_v60 = vpack.c.b16 %v1559_v13, %v1551_v17  ;;  %v5863_v12 = vmax.f32 %v5180_v7, 0.0  ;;  %v5220_v13 = vld [vmem:[%s5839_s4 + $0x50] sm:$0xff] }
 0x155   : > { %v5196_v43 = vsub.f32 %v1153_v22, %v1201_v50  ;;  %5925 = vst [vmem:[#allocation30_spill] sm:$0xff] %v5206_v25  ;;  %v1155_v0 = vmax.f32 %v1123_v24, 0.0  ;;  %v5212_v22 = vadd.f32 %v5018_v46, %v1078_v61  ;;  %2514 = vmatpush.bf16.msra.mxu2 %v5189_v14  ;;  %v1222_v50 = vunpack.c.l.bf16 %v5121_v38  ;;  %2533 = vmatpush.bf16.msra.mxu3 %v5194_v42 }
 0x156   : > { %5923 = vst [vmem:[#allocation28_spill] sm:$0xff] %v5198_v27  ;;  %v1129_v6 = vadd.f32 %v5030_v20, %v1079_v31  ;;  %v5926_v17 = vmax.f32 %v4968_v16, 0.0  ;;  %v1223_v31 = vunpack.c.h.bf16 %v5121_v38  ;;  %2012 = vmatmul.bf16.gmra.mxu2 %v5198_v27  ;;  %v5928_v35 = vmax.f32 %v5077_v48, 0.0  ;;  %2478 = vmatpush.bf16.msra.mxu0 %v5206_v25 }
 0x157   : > { %5922 = vst [vmem:[#allocation27_spill] sm:$0xff] %v5196_v43  ;;  %v5232_v24 = vpack.c.bf16 %v1155_v0, %v5863_v12  ;;  %v5243_v16 = vadd.f32 %v4757_v58, %v4589_v9  ;;  %2031 = vmatmul.bf16.gmra.mxu3 %v5200_v60  ;;  %v1039_v38 = vpop.f32.mrf.mxu2  ;;  %v5260_v9 = vld [vmem:[%s5839_s4 + $0x8] sm:$0xff]  ;;  %v5930_v58 = vmax.f32 %v5071_v1, 0.0  ;;  %v1536_v12 = vunpack.c.l.b16 %v5139_v49  ;;  %2497 = vmatpush.bf16.msra.mxu1 %v5220_v13 }
 0x158   : > { %5924 = vst [vmem:[#allocation29_spill] sm:$0xff] %v5200_v60  ;;  %v5227_v61 = vsub.f32 %v5926_v17, %v1214_v56  ;;  %v1161_v47 = vmax.f32 %v1129_v6, 0.0  ;;  %v5239_v59 = vsub.f32 %v5928_v35, %v1200_v55  ;;  %v1058_v56 = vpop.f32.mrf.mxu3  ;;  %v5250_v6 = vld [vmem:[%s5839_s4 + $0x98] sm:$0xff]  ;;  %v5932_v35 = vmax.f32 %v5074_v57, 0.0 }
 0x159   : > { %v5255_v55 = vld [vmem:[%s5839_s4 + $0xd8] sm:$0xff]  ;;  %v5264_v48 = vsub.f32 %v5930_v58, %v1222_v50  ;;  %v1537_v54 = vunpack.c.h.b16 %v5139_v49  ;;  %v1202_v23 = vunpack.c.l.bf16 %v5232_v24  ;;  %v1203_v5 = vunpack.c.h.bf16 %v5232_v24  ;;  %v1004_v25 = vpop.f32.mrf.mxu0  ;;  %v1023_v60 = vpop.f32.mrf.mxu1  ;;  %v5283_v49 = vld [vmem:[%s5839_s4 + $0x48] sm:$0xff]  ;;  %2515 = vmatpush.bf16.msra.mxu2 %v5250_v6 }
 0x15a   : > { %5927 = vst [vmem:[#allocation31_spill] sm:$0xff] %v5227_v61  ;;  %v5268_v17 = vsub.f32 %v5932_v35, %v1223_v31  ;;  %v5934_v27 = vmax.f32 %v5212_v22, 0.0  ;;  %v1080_v1 = vadd.f32 %v1039_v38, %v5010_v28  ;;  %v1081_v50 = vadd.f32 %v1058_v56, %v5066_v52  ;;  %2534 = vmatpush.bf16.msra.mxu3 %v5255_v55  ;;  %v5324_v61 = vld [vmem:[%s5839_s4 + $0x40] sm:$0xff] }
 0x15b   : > { %5929 = vst [vmem:[#allocation32_spill] sm:$0xff] %v5239_v59  ;;  %v1086_v57 = vadd.f32 %v1004_v25, %v4726_v29  ;;  %v5285_v31 = vsub.f32 %v1155_v0, %v1203_v5  ;;  %v1087_v35 = vadd.f32 %v1023_v60, %v4729_v30  ;;  %v5294_v29 = vld [vmem:[%s5839_s4 + $0x90] sm:$0xff]  ;;  %2479 = vmatpush.bf16.msra.mxu0 %v5260_v9  ;;  %v5311_v25 = vld [vmem:[%s5839_s4] sm:$0xff] }
 0x15c   : > { %5931 = vst [vmem:[#allocation33_spill] sm:$0xff] %v5264_v48  ;;  %v1186_v42 = vpack.c.bf16 %v1161_v47, %v5934_v27  ;;  %v5299_v27 = vld [vmem:[%s5839_s4 + $0xd0] sm:$0xff]  ;;  %v5304_v30 = vadd.f32 %v5124_v2, %v1080_v1  ;;  %v1131_v60 = vadd.f32 %v5127_v26, %v1081_v50  ;;  %2498 = vmatpush.bf16.msra.mxu1 %v5283_v49 }
 0x15d   : > { %5933 = vst [vmem:[#allocation34_spill] sm:$0xff] %v5268_v17  ;;  %v5314_v0 = vadd.f32 %v5018_v46, %v1086_v57  ;;  %v1137_v38 = vadd.f32 %v5030_v20, %v1087_v35  ;;  %2516 = vmatpush.bf16.msra.mxu2 %v5294_v29  ;;  %v5944_v35 = vmax.f32 %v5180_v7, 0.0  ;;  %v1539_v17 = vunpack.c.h.b16 %v5232_v24  ;;  %v5375_v7 = vld [vmem:[%s5839_s4 + $0x178] sm:$0xff] }
 0x15e   : > { %5935 = vst [vmem:[#allocation35_spill] sm:$0xff] %v5285_v31  ;;  %v1208_v28 = vunpack.c.l.bf16 %v1186_v42  ;;  %v1209_v52 = vunpack.c.h.bf16 %v1186_v42  ;;  %v1544_v56 = vunpack.c.l.b16 %v1186_v42  ;;  %v1545_v5 = vunpack.c.h.b16 %v1186_v42  ;;  %2535 = vmatpush.bf16.msra.mxu3 %v5299_v27 }
 0x15f   : > { %5936 = vst [vmem:[#allocation36_spill] sm:$0xff] %v5299_v27  ;;  %v5875_v1 = vmax.f32 %v5304_v30, 0.0  ;;  %v1163_v50 = vmax.f32 %v1131_v60, 0.0  ;;  %v1169_v48 = vmax.f32 %v1137_v38, 0.0  ;;  %v5343_v60 = vld [vmem:[%s5839_s4 + $0xc8] sm:$0xff]  ;;  %2480 = vmatpush.bf16.msra.mxu0 %v5311_v25  ;;  %v5356_v53 = vsub.f32 %v5944_v35, %v1202_v23  ;;  %v5370_v23 = vld [vmem:[%s5839_s4 + $0x138] sm:$0xff] }
 0x160   : > { %5937 = vst [vmem:[#allocation37_spill] sm:$0xff] %v5311_v25  ;;  %v5317_v58 = vsub.f32 %v1161_v47, %v1209_v52  ;;  %v5329_v42 = vpack.c.b16 %v1544_v56, %v1536_v12  ;;  %v5331_v47 = vpack.c.b16 %v1545_v5, %v1537_v54  ;;  %v5338_v52 = vld [vmem:[%s5839_s4 + $0x88] sm:$0xff]  ;;  %v1042_v5 = vpop.f32.mrf.mxu2  ;;  %v1061_v38 = vpop.f32.mrf.mxu3  ;;  %v5942_v56 = vmax.f32 %v5212_v22, 0.0  ;;  %2499 = vmatpush.bf16.msra.mxu1 %v5324_v61  ;;  %v5390_v25 = vld [vmem:[%s5839_s4 + $0x80] sm:$0xff] }
 0x161   : > { %5939 = vst [vmem:[#allocation39_spill] sm:$0xff] %v5324_v61  ;;  %v1187_v54 = vpack.c.bf16 %v1163_v50, %v5875_v1  ;;  %v5945_v27 = vmax.f32 %v5314_v0, 0.0  ;;  %v1088_v1 = vadd.f32 %v1042_v5, %v4750_v33  ;;  %v1089_v22 = vadd.f32 %v1061_v38, %v4753_v44  ;;  %2517 = vmatpush.bf16.msra.mxu2 %v5338_v52 }
 0x162   : > { %5938 = vst [vmem:[#allocation38_spill] sm:$0xff] %v5317_v58  ;;  %v5352_v57 = vsub.f32 %v5942_v56, %v1208_v28  ;;  %2045 = vmatmul.bf16.vlgmr.msrb.gmra.mxu0 %v5329_v42  ;;  %2064 = vmatmul.bf16.vlgmr.msrb.gmra.mxu1 %v5331_v47  ;;  %v1006_v28 = vpop.f32.mrf.mxu0  ;;  %v1025_v56 = vpop.f32.mrf.mxu1 }
 0x163   : > { %5940 = vst [vmem:[#allocation40_spill] sm:$0xff] %v5338_v52  ;;  %v5361_v12 = vpack.c.bf16 %v1169_v48, %v5945_v27  ;;  %v1210_v27 = vunpack.c.l.bf16 %v1187_v54  ;;  %v1211_v35 = vunpack.c.h.bf16 %v1187_v54  ;;  %v1547_v43 = vunpack.c.h.b16 %v1187_v54  ;;  %2536 = vmatpush.bf16.msra.mxu3 %v5343_v60  ;;  %2549 = vmatpush.bf16.msrb.mxu0 %v5370_v23 }
 0x164   : > { %5941 = vst [vmem:[#allocation41_spill] sm:$0xff] %v5343_v60  ;;  %v1094_v58 = vadd.f32 %v1006_v28, %v5135_v4  ;;  %v5381_v44 = vadd.f32 %v5124_v2, %v1088_v1  ;;  %v1139_v5 = vadd.f32 %v5127_v26, %v1089_v22  ;;  %v1095_v38 = vadd.f32 %v1025_v56, %v5243_v16  ;;  %v5395_v4 = vld [vmem:[%s5839_s4 + $0xc0] sm:$0xff] }
 0x165   : > { %5943 = vst [vmem:[#allocation42_spill] sm:$0xff] %v5352_v57  ;;  %v1217_v33 = vunpack.c.h.bf16 %v5361_v12  ;;  %v5397_v1 = vsub.f32 %v1163_v50, %v1211_v35  ;;  %v5399_v28 = vpack.c.b16 %v1547_v43, %v1539_v17  ;;  %v1546_v22 = vunpack.c.l.b16 %v1187_v54  ;;  %2568 = vmatpush.bf16.msrb.mxu1 %v5375_v7  ;;  %v5411_v50 = vld [vmem:[%s5839_s4 + $0x130] sm:$0xff]  ;;  %v5952_v43 = vld [vmem:[#allocation7_spill] sm:$0xff]  ;;  %v5955_v35 = vld [vmem:[#allocation6_spill] sm:$0xff]  ;;  %2518 = vmatpush.bf16.msra.mxu2 %v5390_v25 }
 0x166   : > { %5946 = vst [vmem:[#allocation43_spill] sm:$0xff] %v5390_v25  ;;  %v1144_v16 = vadd.f32 %v5018_v46, %v1094_v58  ;;  %v1170_v60 = vmax.f32 %v5381_v44, 0.0  ;;  %v1171_v52 = vmax.f32 %v1139_v5, 0.0  ;;  %v1145_v61 = vadd.f32 %v5030_v20, %v1095_v38  ;;  %v5416_v46 = vld [vmem:[%s5839_s4 + $0x170] sm:$0xff] }
 0x167   : > { %5947 = vst [vmem:[#allocation44_spill] sm:$0xff] %v5395_v4  ;;  %v5404_v56 = vsub.f32 %v1169_v48, %v1217_v33  ;;  %v887_v17 = vadd.f32 %v5952_v43, %v4591_v10  ;;  %v5953_v54 = vunpack.c.l.b16 %v5232_v24  ;;  %v5956_v33 = vld [vmem:[#allocation8_spill] sm:$0xff]  ;;  %2537 = vmatpush.bf16.msra.mxu3 %v5395_v4  ;;  %v5959_v43 = vmax.f32 %v5304_v30, 0.0  ;;  %2550 = vmatpush.bf16.msrb.mxu0 %v5411_v50  ;;  %v5463_v30 = vld [vmem:[%s5839_s4 + $0x168] sm:$0xff] }
 0x168   : > { %5948 = vst [vmem:[#allocation45_spill] sm:$0xff] %v5397_v1  ;;  %v1176_v58 = vmax.f32 %v1144_v16, 0.0  ;;  %v906_v44 = vadd.f32 %v5956_v33, %v5955_v35  ;;  %v5428_v5 = vpack.c.bf16 %v1171_v52, %v1170_v60  ;;  %v1177_v38 = vmax.f32 %v1145_v61, 0.0  ;;  %3443 = vmatmul.msk.bf16.vlgmr.msrb.gmra.mxu3 %vm1954_vm1, %v5399_v28  ;;  %v1044_v24 = vpop.f32.mrf.mxu2  ;;  %v1063_v16 = vpop.f32.mrf.mxu3  ;;  %v5445_v61 = vld [vmem:[%s5839_s4 + $0x1d8] sm:$0xff]  ;;  %v5458_v1 = vld [vmem:[%s5839_s4 + $0x128] sm:$0xff] }
 0x169   : > { %5949 = vst [vmem:[#allocation46_spill] sm:$0xff] %v5399_v28  ;;  %v5424_v20 = vpack.c.b16 %v1546_v22, %v5953_v54  ;;  %v5440_v22 = vld [vmem:[%s5839_s4 + $0x1b8] sm:$0xff]  ;;  %v5449_v54 = vsub.f32 %v5959_v43, %v1210_v27  ;;  %v1216_v35 = vunpack.c.l.bf16 %v5361_v12  ;;  %v1096_v10 = vadd.f32 %v1044_v24, %v887_v17  ;;  %2569 = vmatpush.bf16.msrb.mxu1 %v5416_v46  ;;  %v5472_v17 = vld [vmem:[%s5839_s4 + $0x1b0] sm:$0xff] }
 0x16a   : > { %5950 = vst [vmem:[#allocation47_spill] sm:$0xff] %v5411_v50  ;;  %v1219_v33 = vunpack.c.h.bf16 %v5428_v5  ;;  %v1194_v48 = vpack.c.bf16 %v1177_v38, %v1176_v58  ;;  %v1097_v31 = vadd.f32 %v1063_v16, %v906_v44  ;;  %v1552_v27 = vunpack.c.l.b16 %v5361_v12  ;;  %v5625_v44 = vld [vmem:[%s5839_s4 + $0x1c0] sm:$0xff] }
 0x16b   : > { %5951 = vst [vmem:[#allocation48_spill] sm:$0xff] %v5416_v46  ;;  %2083 = vmatmul.bf16.vlgmr.msrb.gmra.mxu2 %v5424_v20  ;;  %v1553_v43 = vunpack.c.h.b16 %v5361_v12  ;;  %2610 = vmatpush.bf16.msrb.mxu3 %v5445_v61  ;;  %v5960_v24 = vmax.f32 %v5314_v0, 0.0  ;;  %v1146_v12 = vadd.f32 %v5124_v2, %v1096_v10  ;;  %v1218_v28 = vunpack.c.l.bf16 %v5428_v5  ;;  %v5500_v2 = vld [vmem:[%s5839_s4 + $0x160] sm:$0xff]  ;;  %v5511_v10 = vld [vmem:[%s5839_s4 + $0x1a8] sm:$0xff] }
 0x16c   : > { %5954 = vst [vmem:[#allocation7_spill] sm:$0xff] %v5424_v20  ;;  %2587 = vmatpush.bf16.msrb.mxu2 %v5440_v22  ;;  %v5480_v59 = vsub.f32 %v1171_v52, %v1219_v33  ;;  %v1147_v57 = vadd.f32 %v5127_v26, %v1097_v31  ;;  %v1224_v46 = vunpack.c.l.bf16 %v1194_v48  ;;  %v1225_v50 = vunpack.c.h.bf16 %v1194_v48  ;;  %2551 = vmatpush.bf16.msrb.mxu0 %v5458_v1  ;;  %v5495_v26 = vld [vmem:[%s5839_s4 + $0x120] sm:$0xff]  ;;  %v5531_v33 = vld [vmem:[%s5839_s4 + $0x118] sm:$0xff] }
 0x16d   : > { %5957 = vst [vmem:[#allocation6_spill] sm:$0xff] %v5440_v22  ;;  %v5478_v16 = vsub.f32 %v5960_v24, %v1216_v35  ;;  %v1560_v22 = vunpack.c.l.b16 %v1194_v48  ;;  %v1178_v20 = vmax.f32 %v1146_v12, 0.0  ;;  %2570 = vmatpush.bf16.msrb.mxu1 %v5463_v30  ;;  %v5506_v52 = vsub.f32 %v1170_v60, %v1218_v28  ;;  %v5522_v28 = vld [vmem:[%s5839_s4 + $0x1d0] sm:$0xff] }
 0x16e   : > { %5958 = vst [vmem:[#allocation8_spill] sm:$0xff] %v5445_v61  ;;  %v1561_v61 = vunpack.c.h.b16 %v1194_v48  ;;  %v1179_v4 = vmax.f32 %v1147_v57, 0.0  ;;  %v5502_v31 = vsub.f32 %v1176_v58, %v1224_v46  ;;  %v5504_v57 = vsub.f32 %v1177_v38, %v1225_v50 }
 0x16f   : > { %5961 = vst [vmem:[#allocation49_spill] sm:$0xff] %v5480_v59  ;;  %v5485_v25 = vpack.c.b16 %v1560_v22, %v1552_v27  ;;  %v1554_v58 = vunpack.c.l.b16 %v5428_v5  ;;  %v1555_v38 = vunpack.c.h.b16 %v5428_v5  ;;  %v5536_v27 = vld [vmem:[%s5839_s4 + $0x158] sm:$0xff]  ;;  %2611 = vmatpush.bf16.msrb.mxu3 %v5522_v28  ;;  %v5545_v5 = vld [vmem:[%s5839_s4 + $0x1a0] sm:$0xff]  ;;  %v5618_v22 = vld [vmem:[%s5839_s4 + $0x188] sm:$0xff] }
 0x170   : > { %v5489_v0 = vpack.c.b16 %v1561_v61, %v1553_v43  ;;  %2588 = vmatpush.bf16.msrb.mxu2 %v5472_v17  ;;  %v1195_v48 = vpack.c.bf16 %v1179_v4, %v1178_v20  ;;  %2552 = vmatpush.bf16.msrb.mxu0 %v5495_v26  ;;  %v5607_v61 = vld [vmem:[%s5839_s4 + $0x100] sm:$0xff] }
 0x171   : > { %2571 = vmatpush.bf16.msrb.mxu1 %v5500_v2  ;;  %v5634_v59 = vld [vmem:[%s5839_s4 + $0x180] sm:$0xff] }
 0x172   : > { %v1227_v35 = vunpack.c.h.bf16 %v1195_v48  ;;  %2050 = vmatmul.bf16.gmra.mxu0 %v5485_v25  ;;  %2069 = vmatmul.bf16.gmra.mxu1 %v5489_v0  ;;  %v1562_v50 = vunpack.c.l.b16 %v1195_v48  ;;  %v1563_v60 = vunpack.c.h.b16 %v1195_v48  ;;  %v1226_v46 = vunpack.c.l.bf16 %v1195_v48 }
 0x174   : > { %v5538_v43 = vsub.f32 %v1179_v4, %v1227_v35  ;;  %2589 = vmatpush.bf16.msrb.mxu2 %v5511_v10  ;;  %v5547_v24 = vpack.c.b16 %v1562_v50, %v1554_v58  ;;  %v5549_v12 = vpack.c.b16 %v1563_v60, %v1555_v38  ;;  %v5551_v48 = vsub.f32 %v1178_v20, %v1226_v46  ;;  %v5560_v4 = vld [vmem:[%s5839_s4 + $0x110] sm:$0xff]  ;;  %v5576_v50 = vld [vmem:[%s5839_s4 + $0x198] sm:$0xff]  ;;  %v5581_v60 = vld [vmem:[%s5839_s4 + $0x1c8] sm:$0xff] }
 0x175   : > { %2553 = vmatpush.bf16.msrb.mxu0 %v5531_v33  ;;  %2572 = vmatpush.bf16.msrb.mxu1 %v5536_v27  ;;  %v5565_v35 = vld [vmem:[%s5839_s4 + $0x150] sm:$0xff]  ;;  %v5588_v46 = vld [vmem:[%s5839_s4 + $0x108] sm:$0xff]  ;;  %v5612_v20 = vld [vmem:[%s5839_s4 + $0x140] sm:$0xff] }
 0x176   : > { %v5593_v58 = vld [vmem:[%s5839_s4 + $0x148] sm:$0xff]  ;;  %2612 = vmatpush.bf16.msrb.mxu3 %v5581_v60  ;;  %v5600_v38 = vld [vmem:[%s5839_s4 + $0x190] sm:$0xff] }
 0x178   : > { %2590 = vmatpush.bf16.msrb.mxu2 %v5545_v5  ;;  %3444 = vmatmul.msk.bf16.gmra.mxu3 %vm1954_vm1, %v5549_v12 }
 0x179   : > { %2554 = vmatpush.bf16.msrb.mxu0 %v5560_v4  ;;  %2573 = vmatpush.bf16.msrb.mxu1 %v5565_v35 }
 0x17a   : > { %2613 = vmatpush.bf16.msrb.mxu3 %v5625_v44 }
 0x17b   : > { %2088 = vmatmul.bf16.gmra.mxu2 %v5547_v24 }
 0x17c   : > { %2591 = vmatpush.bf16.msrb.mxu2 %v5576_v50 }
 0x17d   : > { %2555 = vmatpush.bf16.msrb.mxu0 %v5588_v46  ;;  %2574 = vmatpush.bf16.msrb.mxu1 %v5593_v58 }
 0x180   : > { %2592 = vmatpush.bf16.msrb.mxu2 %v5600_v38 }
 0x181   : > { %2556 = vmatpush.bf16.msrb.mxu0 %v5607_v61  ;;  %2575 = vmatpush.bf16.msrb.mxu1 %v5612_v20 }
 0x182   : > { %2481 = vmatmul.bf16.vlgmr.msra.gmra.mxu0 %v4928_v63  ;;  %2500 = vmatmul.bf16.vlgmr.msra.gmra.mxu1 %v4930_v32  ;;  %v5962_v63 = vld [vmem:[#allocation19_spill] sm:$0xff]  ;;  %v5963_v32 = vld [vmem:[#allocation20_spill] sm:$0xff] }
 0x184   : > { %2593 = vmatpush.bf16.msrb.mxu2 %v5618_v22 }
 0x185   : > { %2631 = vmatpush.bf16.msra.mxu0 %v4959_v18  ;;  %2650 = vmatpush.bf16.msra.mxu1 %v4964_v45  ;;  %v5964_v18 = vld [vmem:[#allocation21_spill] sm:$0xff]  ;;  %v5965_v45 = vld [vmem:[#allocation24_spill] sm:$0xff] }
 0x188   : > { %2594 = vmatpush.bf16.msrb.mxu2 %v5634_v59  ;;  %2538 = vmatmul.bf16.vlgmr.msra.gmra.mxu3 %v4996_v21  ;;  %v5967_v21 = vld [vmem:[#allocation28_spill] sm:$0xff] }
 0x189   : > { %2632 = vmatpush.bf16.msra.mxu0 %v5001_v62  ;;  %2651 = vmatpush.bf16.msra.mxu1 %v5006_v41  ;;  %v5968_v62 = vld [vmem:[#allocation29_spill] sm:$0xff]  ;;  %v5969_v41 = vld [vmem:[#allocation30_spill] sm:$0xff] }
 0x18a   : > { %2688 = vmatpush.bf16.msra.mxu3 %v5043_v19  ;;  %v5971_v19 = vld [vmem:[#allocation37_spill] sm:$0xff] }
 0x18b   : > { %2519 = vmatmul.bf16.vlgmr.msra.gmra.mxu2 %v4990_v51  ;;  %v5966_v51 = vld [vmem:[#allocation26_spill] sm:$0xff] }
 0x18c   : > { %2669 = vmatpush.bf16.msra.mxu2 %v5038_v37  ;;  %v5970_v37 = vld [vmem:[#allocation36_spill] sm:$0xff] }
 0x18d   : > { %2633 = vmatpush.bf16.msra.mxu0 %v5057_v15  ;;  %2652 = vmatpush.bf16.msra.mxu1 %v5062_v11  ;;  %v5972_v15 = vld [vmem:[#allocation39_spill] sm:$0xff]  ;;  %v5973_v11 = vld [vmem:[#allocation40_spill] sm:$0xff] }
 0x18e   : > { %2689 = vmatpush.bf16.msra.mxu3 %v5093_v39  ;;  %v5976_v39 = vld [vmem:[#allocation44_spill] sm:$0xff] }
 0x190   : > { %2670 = vmatpush.bf16.msra.mxu2 %v5088_v3  ;;  %v5975_v3 = vld [vmem:[#allocation43_spill] sm:$0xff] }
 0x191   : > { %2634 = vmatpush.bf16.msra.mxu0 %v5963_v32  ;;  %2653 = vmatpush.bf16.msra.mxu1 %v5964_v18 }
 0x192   : > { %2486 = vmatmul.bf16.gmra.mxu0 %v5080_v36  ;;  %2505 = vmatmul.bf16.gmra.mxu1 %v5962_v63  ;;  %v5974_v36 = vld [vmem:[#allocation41_spill] sm:$0xff] }
 0x193   : > { %2690 = vmatpush.bf16.msra.mxu3 %v5151_v8  ;;  %v5978_v8 = vld [vmem:[#allocation46_spill] sm:$0xff] }
 0x194   : > { %2671 = vmatpush.bf16.msra.mxu2 %v5965_v45 }
 0x195   : > { %2635 = vmatpush.bf16.msra.mxu0 %v5171_v34  ;;  %2654 = vmatpush.bf16.msra.mxu1 %v5176_v40  ;;  %v5979_v34 = vld [vmem:[#allocation47_spill] sm:$0xff]  ;;  %v5980_v40 = vld [vmem:[#allocation48_spill] sm:$0xff] }
 0x197   : > { %2691 = vmatpush.bf16.msra.mxu3 %v5966_v51  ;;  %v6001_v51 = vld [vmem:[#allocation33_spill] sm:$0xff] }
 0x198   : > { %2672 = vmatpush.bf16.msra.mxu2 %v5189_v14  ;;  %2543 = vmatmul.bf16.gmra.mxu3 %v5968_v62  ;;  %v5977_v14 = vld [vmem:[#allocation7_spill] sm:$0xff] }
 0x199   : > { %2636 = vmatpush.bf16.msra.mxu0 %v5969_v41  ;;  %2655 = vmatpush.bf16.msra.mxu1 %v5220_v13  ;;  %v5981_v13 = vld [vmem:[#allocation6_spill] sm:$0xff] }
 0x19a   : > { %v6004_v41 = vld [vmem:[#allocation34_spill] sm:$0xff] }
 0x19b   : > { %2524 = vmatmul.bf16.gmra.mxu2 %v5967_v21  ;;  %2692 = vmatpush.bf16.msra.mxu3 %v5255_v55  ;;  %v6002_v21 = vld [vmem:[#allocation31_spill] sm:$0xff] }
 0x19c   : > { %2673 = vmatpush.bf16.msra.mxu2 %v5250_v6  ;;  %v5982_v6 = vld [vmem:[#allocation8_spill] sm:$0xff]  ;;  %v6003_v62 = vpack.c.bf16 %v6001_v51, %v6002_v21 }
 0x19d   : > { %2637 = vmatpush.bf16.msra.mxu0 %v5260_v9  ;;  %2656 = vmatpush.bf16.msra.mxu1 %v5283_v49 }
 0x19f   : > { %2693 = vmatpush.bf16.msra.mxu3 %v5970_v37  ;;  %v6005_v37 = vld [vmem:[#allocation18_spill] sm:$0xff] }
 0x1a0   : > { %2674 = vmatpush.bf16.msra.mxu2 %v5294_v29  ;;  %v5983_v29 = vld [vmem:[#allocation14_spill] sm:$0xff] }
 0x1a1   : > { %2638 = vmatpush.bf16.msra.mxu0 %v5971_v19  ;;  %2657 = vmatpush.bf16.msra.mxu1 %v5972_v15  ;;  %v6006_v19 = vpack.c.bf16 %v6004_v41, %v6005_v37 }
 0x1a2   : > { %2557 = vmatmul.bf16.vlgmr.msrb.gmra.mxu0 %v5329_v42  ;;  %2576 = vmatmul.bf16.vlgmr.msrb.gmra.mxu1 %v5331_v47  ;;  %v5986_v47 = vld [vmem:[#allocation13_spill] sm:$0xff] }
 0x1a3   : > { %2694 = vmatpush.bf16.msra.mxu3 %v5974_v36 }
 0x1a4   : > { %2675 = vmatpush.bf16.msra.mxu2 %v5973_v11 }
 0x1a5   : > { %2707 = vmatpush.bf16.msrb.mxu0 %v5370_v23  ;;  %2726 = vmatpush.bf16.msrb.mxu1 %v5375_v7  ;;  %v5987_v23 = vld [vmem:[#allocation9_spill] sm:$0xff] }
 0x1a6   : > { %v5988_v7 = vpack.c.bf16 %v5986_v47, %v5987_v23 }
 0x1a7   : > { %2695 = vmatpush.bf16.msra.mxu3 %v5976_v39 }
 0x1a8   : > { %2676 = vmatpush.bf16.msra.mxu2 %v5975_v3  ;;  %3685 = vmatmul.msk.bf16.vlgmr.msrb.gmra.mxu3 %vm1954_vm1, %v5978_v8 }
 0x1a9   : > { %2708 = vmatpush.bf16.msrb.mxu0 %v5979_v34  ;;  %2727 = vmatpush.bf16.msrb.mxu1 %v5980_v40  ;;  %v6007_v40 = vld [vmem:[#allocation42_spill] sm:$0xff] }
 0x1ab   : > { %2595 = vmatmul.bf16.vlgmr.msrb.gmra.mxu2 %v5977_v14  ;;  %2768 = vmatpush.bf16.msrb.mxu3 %v5982_v6 }
 0x1ac   : > { %2745 = vmatpush.bf16.msrb.mxu2 %v5981_v13  ;;  %v6008_v13 = vld [vmem:[#allocation32_spill] sm:$0xff] }
 0x1ad   : > { %2709 = vmatpush.bf16.msrb.mxu0 %v5458_v1  ;;  %2728 = vmatpush.bf16.msrb.mxu1 %v5463_v30  ;;  %v6009_v6 = vpack.c.bf16 %v6007_v40, %v6008_v13 }
 0x1af   : > { %2769 = vmatpush.bf16.msrb.mxu3 %v5522_v28 }
 0x1b0   : > { %2746 = vmatpush.bf16.msrb.mxu2 %v5472_v17 }
 0x1b1   : > { %2710 = vmatpush.bf16.msrb.mxu0 %v5495_v26  ;;  %2729 = vmatpush.bf16.msrb.mxu1 %v5500_v2  ;;  %v5992_v2 = vld [vmem:[#allocation15_spill] sm:$0xff] }
 0x1b2   : > { %2562 = vmatmul.bf16.gmra.mxu0 %v5485_v25  ;;  %2581 = vmatmul.bf16.gmra.mxu1 %v5489_v0  ;;  %v5984_v25 = vld [vmem:[#allocation10_spill] sm:$0xff]  ;;  %v5990_v0 = vld [vmem:[#allocation12_spill] sm:$0xff] }
 0x1b3   : > { %2770 = vmatpush.bf16.msrb.mxu3 %v5581_v60  ;;  %v5985_v42 = vpack.c.bf16 %v5983_v29, %v5984_v25 }
 0x1b4   : > { %2747 = vmatpush.bf16.msrb.mxu2 %v5511_v10  ;;  %v5993_v10 = vld [vmem:[#allocation11_spill] sm:$0xff] }
 0x1b5   : > { %2711 = vmatpush.bf16.msrb.mxu0 %v5531_v33  ;;  %2730 = vmatpush.bf16.msrb.mxu1 %v5536_v27  ;;  %v5994_v28 = vpack.c.bf16 %v5992_v2, %v5993_v10 }
 0x1b7   : > { %2771 = vmatpush.bf16.msrb.mxu3 %v5625_v44  ;;  %v5989_v44 = vld [vmem:[#allocation17_spill] sm:$0xff] }
 0x1b8   : > { %2748 = vmatpush.bf16.msrb.mxu2 %v5545_v5  ;;  %3686 = vmatmul.msk.bf16.gmra.mxu3 %vm1954_vm1, %v5549_v12  ;;  %v5991_v26 = vpack.c.bf16 %v5989_v44, %v5990_v0  ;;  %v6015_v44 = vld [vmem:[#allocation35_spill] sm:$0xff] }
 0x1b9   : > { %2712 = vmatpush.bf16.msrb.mxu0 %v5560_v4  ;;  %2731 = vmatpush.bf16.msrb.mxu1 %v5565_v35  ;;  %v5995_v4 = vld [vmem:[#allocation23_spill] sm:$0xff]  ;;  %v5996_v35 = vld [vmem:[#allocation22_spill] sm:$0xff] }
 0x1bb   : > { %2600 = vmatmul.bf16.gmra.mxu2 %v5547_v24 }
 0x1bc   : > { %2749 = vmatpush.bf16.msrb.mxu2 %v5576_v50  ;;  %v5999_v50 = vld [vmem:[#allocation16_spill] sm:$0xff] }
 0x1bd   : > { %v1970_v55 = vpop.f32.mrf.mxu0  ;;  %v1989_v9 = vpop.f32.mrf.mxu1  ;;  %2713 = vmatpush.bf16.msrb.mxu0 %v5588_v46  ;;  %2732 = vmatpush.bf16.msrb.mxu1 %v5593_v58 }
 0x1be   : > { %v1990_v49 = vadd.f32 %v1989_v9, %v1970_v55  ;;  %v6010_v55 = vld [vmem:[#allocation38_spill] sm:$0xff]  ;;  %v6011_v9 = vld [vmem:[#allocation27_spill] sm:$0xff] }
 0x1c0   : > { %2750 = vmatpush.bf16.msrb.mxu2 %v5600_v38 }
 0x1c1   : > { %2714 = vmatpush.bf16.msrb.mxu0 %v5607_v61  ;;  %2733 = vmatpush.bf16.msrb.mxu1 %v5612_v20  ;;  %v5997_v20 = vpack.c.bf16 %v5995_v4, %v5996_v35 }
 0x1c2   : > { %2639 = vmatmul.bf16.vlgmr.msra.gmra.mxu0 %v5985_v42  ;;  %2658 = vmatmul.bf16.vlgmr.msra.gmra.mxu1 %v5988_v7 }
 0x1c4   : > { %2751 = vmatpush.bf16.msrb.mxu2 %v5618_v22 }
 0x1c5   : > { %v1972_v1 = vpop.f32.mrf.mxu0  ;;  %v1991_v30 = vpop.f32.mrf.mxu1 }
 0x1c6   : > { %v1992_v17 = vadd.f32 %v1991_v30, %v1972_v1  ;;  %v6013_v30 = vpack.c.bf16 %v5449_v54, %v5356_v53  ;;  %v6018_v53 = vpack.c.bf16 %v5504_v57, %v5404_v56 }
 0x1c8   : > { %2752 = vmatpush.bf16.msrb.mxu2 %v5634_v59  ;;  %2696 = vmatmul.bf16.vlgmr.msra.gmra.mxu3 %v5994_v28  ;;  %v5998_v59 = vld [vmem:[#allocation25_spill] sm:$0xff] }
 0x1c9   : > { %v2008_v33 = vpop.f32.mrf.mxu2  ;;  %v6000_v60 = vpack.c.bf16 %v5998_v59, %v5999_v50 }
 0x1ca   : > { %v2009_v27 = vadd.f32 %v2008_v33, %v1990_v49  ;;  %v2027_v61 = vpop.f32.mrf.mxu3  ;;  %v6012_v49 = vpack.c.bf16 %v6010_v55, %v6011_v9 }
 0x1cb   : > { %2677 = vmatmul.bf16.vlgmr.msra.gmra.mxu2 %v5991_v26 }
 0x1cc   : > { %v2028_v5 = vadd.f32 %v2027_v61, %v2009_v27 }
 0x1cd   : > { %v1975_v24 = vpop.f32.mrf.mxu0  ;;  %v1994_v12 = vpop.f32.mrf.mxu1 }
 0x1ce   : > { %v1995_v22 = vadd.f32 %v1994_v12, %v1975_v24  ;;  %v6017_v12 = vpack.c.bf16 %v5502_v31, %v5478_v16 }
 0x1d1   : > { %v2010_v46 = vpop.f32.mrf.mxu2 }
 0x1d2   : > { %2644 = vmatmul.bf16.gmra.mxu0 %v5997_v20  ;;  %2663 = vmatmul.bf16.gmra.mxu1 %v6000_v60  ;;  %v2011_v58 = vadd.f32 %v2010_v46, %v1992_v17  ;;  %v2029_v38 = vpop.f32.mrf.mxu3  ;;  %v6014_v17 = vld [vmem:[#allocation45_spill] sm:$0xff]  ;;  %v6019_v60 = vpack.c.bf16 %v5551_v48, %v5506_v52 }
 0x1d3   : > { %v6016_v0 = vpack.c.bf16 %v6014_v17, %v6015_v44  ;;  %v6020_v46 = vld [vmem:[#allocation49_spill] sm:$0xff] }
 0x1d4   : > { %v2030_v63 = vadd.f32 %v2029_v38, %v2011_v58  ;;  %v6021_v58 = vpack.c.bf16 %v5538_v43, %v6020_v46 }
 0x1d5   : > { %v1977_v32 = vpop.f32.mrf.mxu0  ;;  %v1996_v18 = vpop.f32.mrf.mxu1 }
 0x1d6   : > { %v1997_v45 = vadd.f32 %v1996_v18, %v1977_v32 }
 0x1d8   : > { %2701 = vmatmul.bf16.gmra.mxu3 %v6006_v19 }
 0x1d9   : > { %v2013_v15 = vpop.f32.mrf.mxu2 }
 0x1da   : > { %v2014_v11 = vadd.f32 %v2013_v15, %v1995_v22  ;;  %v2032_v36 = vpop.f32.mrf.mxu3 }
 0x1db   : > { %2682 = vmatmul.bf16.gmra.mxu2 %v6003_v62 }
 0x1dc   : > { %v2033_v3 = vadd.f32 %v2032_v36, %v2014_v11 }
 0x1df   : > { %v2046_v39 = vpop.f32.mrf.mxu0  ;;  %v2065_v14 = vpop.f32.mrf.mxu1 }
 0x1e0   : > { %v2047_v8 = vadd.f32 %v2046_v39, %v2028_v5 }
 0x1e1   : > { %v2015_v29 = vpop.f32.mrf.mxu2 }
 0x1e2   : > { %v2066_v34 = vadd.f32 %v2065_v14, %v2047_v8  ;;  %2715 = vmatmul.bf16.vlgmr.msrb.gmra.mxu0 %v6009_v6  ;;  %2734 = vmatmul.bf16.vlgmr.msrb.gmra.mxu1 %v6012_v49  ;;  %v2016_v25 = vadd.f32 %v2015_v29, %v1997_v45  ;;  %v2034_v42 = vpop.f32.mrf.mxu3 }
 0x1e4   : > { %v2035_v47 = vadd.f32 %v2034_v42, %v2016_v25 }
 0x1e7   : > { %v2048_v23 = vpop.f32.mrf.mxu0  ;;  %v2067_v7 = vpop.f32.mrf.mxu1 }
 0x1e8   : > { %v2049_v1 = vadd.f32 %v2048_v23, %v2030_v63  ;;  %3687 = vmatmul.msk.bf16.vlgmr.msrb.gmra.mxu3 %vm1954_vm1, %v6016_v0 }
 0x1ea   : > { %v2068_v26 = vadd.f32 %v2067_v7, %v2049_v1 }
 0x1eb   : > { %2753 = vmatmul.bf16.vlgmr.msrb.gmra.mxu2 %v6013_v30  ;;  %v2103_v10 = vpop.f32.mrf.mxu3 }
 0x1ee   : > { %v2084_v2 = vpop.f32.mrf.mxu2 }
 0x1ef   : > { %v2085_v28 = vadd.f32 %v2084_v2, %v2066_v34  ;;  %v2051_v27 = vpop.f32.mrf.mxu0  ;;  %v2070_v61 = vpop.f32.mrf.mxu1 }
 0x1f0   : > { %v2052_v5 = vadd.f32 %v2051_v27, %v2033_v3 }
 0x1f1   : > { %v2104_v33 = vadd.f32 %v2103_v10, %v2085_v28 }
 0x1f2   : > { %v2071_v24 = vadd.f32 %v2070_v61, %v2052_v5  ;;  %2720 = vmatmul.bf16.gmra.mxu0 %v6017_v12  ;;  %2739 = vmatmul.bf16.gmra.mxu1 %v6018_v53 }
 0x1f3   : > { %v2105_v22 = vpop.f32.mrf.mxu3 }
 0x1f6   : > { %v2086_v54 = vpop.f32.mrf.mxu2 }
 0x1f7   : > { %v2087_v4 = vadd.f32 %v2086_v54, %v2068_v26  ;;  %v2053_v20 = vpop.f32.mrf.mxu0  ;;  %v2072_v59 = vpop.f32.mrf.mxu1 }
 0x1f8   : > { %v2054_v50 = vadd.f32 %v2053_v20, %v2035_v47  ;;  %3688 = vmatmul.msk.bf16.gmra.mxu3 %vm1954_vm1, %v6021_v58 }
 0x1f9   : > { %v2106_v35 = vadd.f32 %v2105_v22, %v2087_v4 }
 0x1fa   : > { %v2073_v16 = vadd.f32 %v2072_v59, %v2054_v50 }
 0x1fb   : > { %2758 = vmatmul.bf16.gmra.mxu2 %v6019_v60  ;;  %v2108_v56 = vpop.f32.mrf.mxu3 }
 0x1fe   : > { %v2089_v31 = vpop.f32.mrf.mxu2 }
 0x1ff   : > { %v2090_v57 = vadd.f32 %v2089_v31, %v2071_v24  ;;  %v2482_v63 = vpop.f32.mrf.mxu0  ;;  %v2501_v32 = vpop.f32.mrf.mxu1 }
 0x200   : > { %v2483_v18 = vadd.f32 %v2482_v63, %v2104_v33 }
 0x201   : > { %v2109_v38 = vadd.f32 %v2108_v56, %v2090_v57 }
 0x202   : > { %v2502_v45 = vadd.f32 %v2501_v32, %v2483_v18 }
 0x203   : > { %v2110_v21 = vpop.f32.mrf.mxu3 }
 0x206   : > { %v2091_v51 = vpop.f32.mrf.mxu2 }
 0x207   : > { %v2092_v62 = vadd.f32 %v2091_v51, %v2073_v16  ;;  %v2484_v52 = vpop.f32.mrf.mxu0  ;;  %v2503_v48 = vpop.f32.mrf.mxu1 }
 0x208   : > { %v2485_v37 = vadd.f32 %v2484_v52, %v2106_v35 }
 0x209   : > { %v2111_v41 = vadd.f32 %v2110_v21, %v2092_v62 }
 0x20a   : > { %v2504_v19 = vadd.f32 %v2503_v48, %v2485_v37 }
 0x20b   : > { %v2539_v15 = vpop.f32.mrf.mxu3 }
 0x20e   : > { %v2520_v43 = vpop.f32.mrf.mxu2 }
 0x20f   : > { %v2521_v11 = vadd.f32 %v2520_v43, %v2502_v45  ;;  %v2487_v3 = vpop.f32.mrf.mxu0  ;;  %v2506_v39 = vpop.f32.mrf.mxu1 }
 0x210   : > { %v2488_v14 = vadd.f32 %v2487_v3, %v2109_v38 }
 0x211   : > { %v2540_v36 = vadd.f32 %v2539_v15, %v2521_v11 }
 0x212   : > { %v2507_v8 = vadd.f32 %v2506_v39, %v2488_v14 }
 0x213   : > { %v2541_v40 = vpop.f32.mrf.mxu3 }
 0x216   : > { %v2522_v34 = vpop.f32.mrf.mxu2 }
 0x217   : > { %v2523_v13 = vadd.f32 %v2522_v34, %v2504_v19  ;;  %v2489_v55 = vpop.f32.mrf.mxu0  ;;  %v2508_v9 = vpop.f32.mrf.mxu1 }
 0x218   : > { %v2490_v49 = vadd.f32 %v2489_v55, %v2111_v41 }
 0x219   : > { %v2542_v6 = vadd.f32 %v2541_v40, %v2523_v13 }
 0x21a   : > { %v2509_v29 = vadd.f32 %v2508_v9, %v2490_v49 }
 0x21b   : > { %v2544_v42 = vpop.f32.mrf.mxu3 }
 0x21e   : > { %v2525_v25 = vpop.f32.mrf.mxu2 }
 0x21f   : > { %v2526_v47 = vadd.f32 %v2525_v25, %v2507_v8  ;;  %v2558_v7 = vpop.f32.mrf.mxu0  ;;  %v2577_v1 = vpop.f32.mrf.mxu1 }
 0x220   : > { %v2559_v30 = vadd.f32 %v2558_v7, %v2540_v36 }
 0x221   : > { %v2545_v23 = vadd.f32 %v2544_v42, %v2526_v47 }
 0x222   : > { %v2578_v17 = vadd.f32 %v2577_v1, %v2559_v30 }
 0x223   : > { %v2546_v0 = vpop.f32.mrf.mxu3 }
 0x226   : > { %v2527_v44 = vpop.f32.mrf.mxu2 }
 0x227   : > { %v2528_v26 = vadd.f32 %v2527_v44, %v2509_v29  ;;  %v2560_v10 = vpop.f32.mrf.mxu0  ;;  %v2579_v28 = vpop.f32.mrf.mxu1 }
 0x228   : > { %v2561_v33 = vadd.f32 %v2560_v10, %v2542_v6 }
 0x229   : > { %v2547_v2 = vadd.f32 %v2546_v0, %v2528_v26 }
 0x22a   : > { %v2580_v27 = vadd.f32 %v2579_v28, %v2561_v33 }
 0x22b   : > { %v2615_v5 = vpop.f32.mrf.mxu3 }
 0x22e   : > { %v2596_v61 = vpop.f32.mrf.mxu2 }
 0x22f   : > { %v2597_v24 = vadd.f32 %v2596_v61, %v2578_v17  ;;  %v2563_v53 = vpop.f32.mrf.mxu0  ;;  %v2582_v54 = vpop.f32.mrf.mxu1 }
 0x230   : > { %v2564_v22 = vadd.f32 %v2563_v53, %v2545_v23 }
 0x231   : > { %v2616_v12 = vadd.f32 %v2615_v5, %v2597_v24 }
 0x232   : > { %v2583_v4 = vadd.f32 %v2582_v54, %v2564_v22 }
 0x233   : > { %v2617_v20 = vpop.f32.mrf.mxu3 }
 0x236   : > { %v2598_v35 = vpop.f32.mrf.mxu2 }
 0x237   : > { %v2599_v59 = vadd.f32 %v2598_v35, %v2580_v27  ;;  %v2565_v60 = vpop.f32.mrf.mxu0  ;;  %v2584_v46 = vpop.f32.mrf.mxu1 }
 0x238   : > { %v2566_v58 = vadd.f32 %v2565_v60, %v2547_v2 }
 0x239   : > { %v2618_v50 = vadd.f32 %v2617_v20, %v2599_v59 }
 0x23a   : > { %v2585_v16 = vadd.f32 %v2584_v46, %v2566_v58 }
 0x23b   : > { %v2620_v56 = vpop.f32.mrf.mxu3 }
 0x23e   : > { %v2601_v31 = vpop.f32.mrf.mxu2 }
 0x23f   : > { %v2602_v57 = vadd.f32 %v2601_v31, %v2583_v4  ;;  %v2640_v63 = vpop.f32.mrf.mxu0  ;;  %v2659_v32 = vpop.f32.mrf.mxu1 }
 0x240   : > { %v2660_v14 = vadd.f32 %v2659_v32, %v2640_v63 }
 0x241   : > { %v5763_v38 = vadd.f32 %v2620_v56, %v2602_v57 }
 0x243   : > { %v2622_v45 = vpop.f32.mrf.mxu3 }
 0x246   : > { %v2603_v18 = vpop.f32.mrf.mxu2 }
 0x247   : > { %v2604_v51 = vadd.f32 %v2603_v18, %v2585_v16  ;;  %v2642_v62 = vpop.f32.mrf.mxu0  ;;  %v2661_v41 = vpop.f32.mrf.mxu1 }
 0x248   : > { %v2662_v9 = vadd.f32 %v2661_v41, %v2642_v62 }
 0x249   : > { %v5765_v21 = vadd.f32 %v2622_v45, %v2604_v51 }
 0x24b   : > { %v2697_v48 = vpop.f32.mrf.mxu3 }
 0x24e   : > { %v2678_v52 = vpop.f32.mrf.mxu2 }
 0x24f   : > { %v2645_v37 = vpop.f32.mrf.mxu0  ;;  %v2664_v19 = vpop.f32.mrf.mxu1  ;;  %v2679_v34 = vadd.f32 %v2678_v52, %v2660_v14 }
 0x250   : > { %v2665_v30 = vadd.f32 %v2664_v19, %v2645_v37 }
 0x251   : > { %v2698_v55 = vadd.f32 %v2697_v48, %v2679_v34 }
 0x253   : > { %v2699_v15 = vpop.f32.mrf.mxu3 }
 0x256   : > { %v2680_v43 = vpop.f32.mrf.mxu2 }
 0x257   : > { %v2647_v11 = vpop.f32.mrf.mxu0  ;;  %v2666_v36 = vpop.f32.mrf.mxu1  ;;  %v2681_v25 = vadd.f32 %v2680_v43, %v2662_v9  ;;  %v2849_v9 = vstv %s2787_s22 }
 0x258   : > { %v2667_v53 = vadd.f32 %v2666_v36, %v2647_v11 }
 0x259   : > { %v2700_v7 = vadd.f32 %v2699_v15, %v2681_v25 }
 0x25b   : > { %v2702_v39 = vpop.f32.mrf.mxu3 }
 0x25e   : > { %v2683_v3 = vpop.f32.mrf.mxu2 }
 0x25f   : > { %v2716_v8 = vpop.f32.mrf.mxu0  ;;  %v2735_v40 = vpop.f32.mrf.mxu1  ;;  %v2684_v26 = vadd.f32 %v2683_v3, %v2665_v30 }
 0x260   : > { %v2717_v49 = vadd.f32 %v2716_v8, %v2698_v55 }
 0x261   : > { %v2703_v33 = vadd.f32 %v2702_v39, %v2684_v26 }
 0x262   : > { %v2736_v42 = vadd.f32 %v2735_v40, %v2717_v49 }
 0x263   : > { %v2704_v6 = vpop.f32.mrf.mxu3 }
 0x266   : > { %v2685_v13 = vpop.f32.mrf.mxu2 }
 0x267   : > { %v2718_v29 = vpop.f32.mrf.mxu0  ;;  %v2737_v17 = vpop.f32.mrf.mxu1  ;;  %v2686_v4 = vadd.f32 %v2685_v13, %v2667_v53 }
 0x268   : > { %v2719_v44 = vadd.f32 %v2718_v29, %v2700_v7 }
 0x269   : > { %v2705_v56 = vadd.f32 %v2704_v6, %v2686_v4 }
 0x26a   : > { %v2738_v28 = vadd.f32 %v2737_v17, %v2719_v44 }
 0x26b   : > { %v2773_v23 = vpop.f32.mrf.mxu3 }
 0x26e   : > { %v2754_v47 = vpop.f32.mrf.mxu2 }
 0x26f   : > { %v2755_v1 = vadd.f32 %v2754_v47, %v2736_v42  ;;  %v2721_v10 = vpop.f32.mrf.mxu0  ;;  %v2740_v22 = vpop.f32.mrf.mxu1 }
 0x270   : > { %v2722_v24 = vadd.f32 %v2721_v10, %v2703_v33 }
 0x271   : > { %v2774_v0 = vadd.f32 %v2773_v23, %v2755_v1 }
 0x272   : > { %v2741_v20 = vadd.f32 %v2740_v22, %v2722_v24 }
 0x273   : > { %v5767_v2 = vadd.f32 %v2774_v0, %v2616_v12  ;;  %v2775_v61 = vpop.f32.mrf.mxu3 }
 0x275   : > { %2805 = vrot.lane.b32.xlu1 %v5767_v2, %s3970_s20  ;;  %v2822_v60 = vrot.slane %v5767_v2, 1  ;;  %v2793_v46 = vrot.slane %v5767_v2, 7 }
 0x276   : > { %v2756_v27 = vpop.f32.mrf.mxu2 }
 0x277   : > { %v2757_v5 = vadd.f32 %v2756_v27, %v2738_v28  ;;  %v2723_v12 = vpop.f32.mrf.mxu0  ;;  %v2742_v51 = vpop.f32.mrf.mxu1  ;;  %v2804_v10 = vsel %vm2792_vm3, %v5767_v2, %v2793_v46 }
 0x278   : > { %v2724_v32 = vadd.f32 %v2723_v12, %v2705_v56 }
 0x279   : > { %v2776_v54 = vadd.f32 %v2775_v61, %v2757_v5 }
 0x27a   : > { %v2743_v62 = vadd.f32 %v2742_v51, %v2724_v32 }
 0x27b   : > { %v2784_v35 = vadd.f32 %v2776_v54, %v2618_v50  ;;  %v2778_v31 = vpop.f32.mrf.mxu3 }
 0x27d   : > { %2807 = vrot.lane.b32.xlu1 %v2784_v35, %s3970_s20  ;;  %v2823_v59 = vrot.slane %v2784_v35, 1  ;;  %v2794_v58 = vrot.slane %v2784_v35, 7 }
 0x27e   : > { %v2759_v16 = vpop.f32.mrf.mxu2 }
 0x27f   : > { %v2760_v57 = vadd.f32 %v2759_v16, %v2741_v20  ;;  %v2824_v63 = vsel %vm2821_vm2, %v2822_v60, %v2823_v59  ;;  %v2795_v50 = vsel %vm2792_vm3, %v2793_v46, %v2794_v58 }
 0x281   : > { %v2779_v18 = vadd.f32 %v2778_v31, %v2760_v57 }
 0x283   : > { %v2785_v45 = vadd.f32 %v2779_v18, %v5763_v38  ;;  %v2780_v15 = vpop.f32.mrf.mxu3 }
 0x285   : > { %2809 = vrot.lane.b32.xlu0 %v2785_v45, %s3970_s20  ;;  %v2825_v41 = vrot.slane %v2785_v45, 1  ;;  %v2796_v52 = vrot.slane %v2785_v45, 7 }
 0x286   : > { %v2761_v48 = vpop.f32.mrf.mxu2 }
 0x287   : > { %v2762_v37 = vadd.f32 %v2761_v48, %v2743_v62  ;;  %v2826_v19 = vsel %vm2821_vm2, %v2823_v59, %v2825_v41  ;;  %v2797_v43 = vsel %vm2792_vm3, %v2794_v58, %v2796_v52 }
 0x288   : > { %2835 = vrot.lane.b32.xlu1 %v2826_v19, %s3971_s17 }
 0x289   : > { %v2781_v11 = vadd.f32 %v2780_v15, %v2762_v37 }
 0x28b   : > { %v2786_v36 = vadd.f32 %v2781_v11, %v5765_v21 }
 0x28d   : > { %2811 = vrot.lane.b32.xlu0 %v2786_v36, %s3970_s20  ;;  %v2827_v38 = vrot.slane %v2786_v36, 1  ;;  %v2798_v3 = vrot.slane %v2786_v36, 7 }
 0x28f   : > { %v2828_v39 = vsel %vm2821_vm2, %v2825_v41, %v2827_v38  ;;  %v2799_v14 = vsel %vm2792_vm3, %v2796_v52, %v2798_v3  ;;  %v2831_v8 = vsel %vm2830_vm4, %v2827_v38, %v2786_v36 }
 0x290   : > { %2837 = vrot.lane.b32.xlu2 %v2828_v39, %s3971_s17 }
 0x295   : > { %2833 = vrot.lane.b32.xlu0 %v2824_v63, %s3971_s17 }
 0x298   : > { %2839 = vrot.lane.b32.xlu2 %v2831_v8, %s3971_s17  ;;  %s3926_s17 = scalar_lea.hbm %s5842_s7, 64 }
 0x299   : > { %p3928_p1 = scmp.lt.s32.totalorder %s3926_s17, %s3922_s21 }
 0x29b   : > { %p3929_p2 = por %p3928_p1, %p3927_p0 }
 0x29d   : > { %p3930_p3 = pnand %p3929_p2, %p3925_p13 }
 0x2e7   : > { %v2806_v34 = vpop.permute.xlu1 %2805 }
 0x2e8   : > { %v2817_v28 = vadd.f32 %v2806_v34, %v2804_v10 }
 0x2ea   : > { %v2838_v13 = vpop.permute.xlu2 %2837 }
 0x2ef   : > { %v2808_v40 = vpop.permute.xlu1 %2807 }
 0x2f0   : > { %v2818_v55 = vadd.f32 %v2808_v40, %v2795_v50 }
 0x2f2   : > { %v2840_v17 = vpop.permute.xlu2 %2839 }
 0x2f7   : > { %v2810_v21 = vpop.permute.xlu0 %2809 }
 0x2f8   : > { %v2819_v6 = vadd.f32 %v2810_v21, %v2797_v43 }
 0x2fa   : > { %v2847_v49 = vadd.f32 %v2838_v13, %v2819_v6  ;;  %v2836_v29 = vpop.permute.xlu1 %2835 }
 0x2fb   : > { %v2846_v25 = vadd.f32 %v2836_v29, %v2818_v55 }
 0x2fc   : > { %v2852_v42 = vadd.f32 %v2849_v9, %v2847_v49 }
 0x2fd   : > { %v2851_v47 = vadd.f32 %v2849_v9, %v2846_v25 }
 0x2fe   : > { %v2861_v23 = vrot.slane %v2852_v42, 7 }
 0x2ff   : > { %v2859_v7 = vrot.slane %v2851_v47, 7  ;;  %v2812_v1 = vpop.permute.xlu0 %2811 }
 0x300   : > { %v2820_v30 = vadd.f32 %v2812_v1, %v2799_v14 }
 0x301   : > { %v2862_v44 = vsel %vm2792_vm3, %v2859_v7, %v2861_v23 }
 0x302   : > { %2876 = vst.msk [vmem:[%s273_s25 + $0x10] sm:$0xff] %vm2873_vm5, %v2862_v44  ;;  %v2848_v0 = vadd.f32 %v2840_v17, %v2820_v30 }
 0x304   : > { %v2853_v26 = vadd.f32 %v2849_v9, %v2848_v0 }
 0x306   : > { %v2863_v33 = vrot.slane %v2853_v26, 7  ;;  %v2869_v27 = vrot.slane %v2853_v26, 6 }
 0x307   : > { %v2834_v61 = vpop.permute.xlu0 %2833 }
 0x308   : > { %v2864_v5 = vsel %vm2792_vm3, %v2861_v23, %v2863_v33  ;;  %v2845_v24 = vadd.f32 %v2834_v61, %v2817_v28 }
 0x309   : > { %v2872_v53 = vsel %vm2821_vm2, %v2864_v5, %v2869_v27 }
 0x30a   : > { %2877 = vst.msk [vmem:[%s273_s25 + $0x18] sm:$0xff] %vm2873_vm5, %v2872_v53  ;;  %v2850_v54 = vadd.f32 %v2849_v9, %v2845_v24 }
 0x30c   : > { %v2858_v2 = vrot.slane %v2850_v54, 7 }
 0x30e   : > { %v2860_v22 = vsel %vm2792_vm3, %v2858_v2, %v2859_v7  ;;  %v2871_v4 = vsel %vm2792_vm3, %v2850_v54, %v2858_v2 }
 0x30f   : > { %2874 = vst.msk [vmem:[%s273_s25] sm:$0xff] %vm2873_vm5, %v2871_v4 }
 0x310   : > { %2875 = vst.msk [vmem:[%s273_s25 + $0x8] sm:$0xff] %vm2873_vm5, %v2860_v22 }
 0x311   : > { %3933 = shalt.err (!%p3930_p3)
}
 0x312   : > { %s3972_s23 = smov 128   ;;  %s3973_s25 = smov 8  }
 0x313   : > { %3863 = dma.vmem_to_hbm [thread:$0]  (%p4055_p5), %s2892_s15, 512, %s2894_s6, %s2879_s16, %s3972_s23, %s3972_s23, %s3973_s25  }
 0x314 PF: > { %p3869_p4 = scmp.ge.s32.totalorder %s3968_s29, 2  ;;  %s2908_s30 = sand.u32 1, %s3956_s26  }
 0x315   : > { %s2909_s9 = scalar_lea.sflag [#allocation4], %s2908_s30 }
 0x316   : > { %p3866_p7 = pnand %p3869_p4, %p4059_p6 }
 0x318   : > { %p3867_p8 = pneg %p3866_p7 }
 0x31a   : > { %3951 = dma.done.wait (%p3867_p8), %s2909_s9, 512  }
 0x31b   : > { %3953 = vsyncadd (%p3867_p8), %s2909_s9, 4294966784  ;;  %p18_p9 = scmp.ge.s32.totalorder %s4042_s8, 4   ;;  %s6022_s26 = smov %s3960_s27 }
 0x31c   : > { %s6023_s27 = smov %s3964_s28  ;;  %s6024_s28 = smov %s4053_s11 }
 0x31d   : > { %s6025_s29 = smov %s4042_s8  ;;  %20 = sbr.rel (!%p18_p9) target bundleno = 5 (0x5), region = 83 }
 0x322   :  { %2915 = vsyncpa [#allocation4], 1 }
 0x323   :  { %2917 = vsyncpa [#allocation4 + $0x1], 1 }

</bundles_post_ra>
